<compile_context>
chip_gen: v6e
topology: v6e:2x2x1
jax: 0.10.0
libtpu: 0.0.40
codegen_flags: <defaults>
</compile_context>

<pallas_src>
import jax
import jax.numpy as jnp
from jax.experimental import pallas as pl
from jax.experimental.pallas import tpu as pltpu

# ---------------------------------------------------------------------------
# Problem sizes (consistent with the module's __init__)
# ---------------------------------------------------------------------------
B = 2              # batch
C = 4              # input_shape[0]  (input channels)
H = 8              # input_shape[1]
W = 8              # input_shape[2]
F = 8              # n_out_channels
L = 32             # n_latent_var
A = 4              # action_dim
HW = H * W
D = F * HW         # per-branch flattened feature size (512)
FM = 2 * F         # merged channels (actor || critic) = 16
LM = 2 * L         # merged latent = 64
OUTP = 128         # lane-dense padded head width per branch


# ---------------------------------------------------------------------------
# Fused kernel: single step, both branches at once
# ---------------------------------------------------------------------------
def actor_critic_kernel(x_ref,                      # (B, H, W*C)      lane-dense state
                        w0_ref, b0_ref,             # (9, W*C, W*FM), (1, W*FM)
                        w1_ref, b1_ref,             # (9, W*FM, W*FM), (1, W*FM)
                        wl0_ref, bl0_ref,           # (H*W*FM, LM), (1, LM)
                        wl1_ref, bl1_ref,           # (LM, 2*OUTP), (1, 2*OUTP)
                        probs_ref, value_ref):      # (B, OUTP) each

    def _roll_rows(a, k):
        """Circular shift along H (axis 1): out[:, h, :] = a[:, (h - k) % H, :]."""
        k = k % H
        if k == 0:
            return a
        return jnp.concatenate([a[:, H - k:, :], a[:, :H - k, :]], axis=1)

    def _roll_lanes(a, k):
        """Circular shift along lanes (last axis): out[..., i] = a[..., (i - k) % n]."""
        n = a.shape[-1]
        k = k % n
        if k == 0:
            return a
        return jnp.concatenate([a[..., n - k:], a[..., :n - k]], axis=-1)

    def conv3x3(a3, w_ref, b_ref, cin):
        """Circular-pad 3x3 conv: 9 static shifts + MXU matmuls (block-diag over W).

        a3: (B, H, W*cin);  w_ref[t]: (W*cin, W*FM);  returns (B*H, W*FM) post-ReLU.
        """
        acc = None
        for ky in range(3):
            for kx in range(3):
                t = ky * 3 + kx
                # input needed at output (h, w): a[(h + ky - 1) % H, (w + kx - 1) % W]
                s = _roll_lanes(_roll_rows(a3, -(ky - 1)), -(kx - 1) * cin)
                contrib = jnp.dot(s.reshape(B * H, W * cin), w_ref[t],
                                  preferred_element_type=jnp.float32)
                acc = contrib if acc is None else acc + contrib
        return jnp.maximum(acc + b_ref[...], 0.0)                    # (B*H, W*FM)

    # ----- merged conv trunk (actor channels 0..F-1, critic F..2F-1) -----
    h0 = conv3x3(x_ref[...], w0_ref, b0_ref, C)                      # (16, 128)
    h1 = conv3x3(h0.reshape(B, H, W * FM), w1_ref, b1_ref, FM)       # (16, 128)

    # ----- head layer 0: single matmul (flatten permutation folded into wl0) -----
    hid = jnp.maximum(
        jnp.dot(h1.reshape(B, H * W * FM), wl0_ref[...],
                preferred_element_type=jnp.float32) + bl0_ref[...], 0.0)   # (B, LM)

    # ----- head layer 1: single matmul -> [actor logits | critic value] slab -----
    logits = jnp.dot(hid, wl1_ref[...],
                     preferred_element_type=jnp.float32) + bl1_ref[...]    # (B, 2*OUTP)

    la = logits[:, :OUTP]                       # actor logits, padded lanes at -1e9
    m = jnp.max(la, axis=-1, keepdims=True)
    e = jnp.exp(la - m)
    probs_ref[...] = e / jnp.sum(e, axis=-1, keepdims=True)   # exact normalization
    value_ref[...] = logits[:, OUTP:]           # critic value in lane 0


# ---------------------------------------------------------------------------
# pallas_call wrapper
# ---------------------------------------------------------------------------
def _fused_forward(state_nchw, q):
    # NCHW -> lane-dense (B, H, W*C): element [b, h, w*C + c] = state[b, c, h, w]
    x = jnp.transpose(state_nchw, (0, 2, 3, 1)).reshape(B, H, W * C)
    probs_pad, value_pad = pl.pallas_call(
        actor_critic_kernel,
        out_shape=(jax.ShapeDtypeStruct((B, OUTP), jnp.float32),
                   jax.ShapeDtypeStruct((B, OUTP), jnp.float32)),
        grid=(1,),
        in_specs=[
            pl.BlockSpec((B, H, W * C), lambda i: (0, 0, 0)),          # state
            pl.BlockSpec((9, W * C, W * FM), lambda i: (0, 0, 0)),     # conv0 taps
            pl.BlockSpec((1, W * FM), lambda i: (0, 0)),               # conv0 bias
            pl.BlockSpec((9, W * FM, W * FM), lambda i: (0, 0, 0)),    # conv1 taps
            pl.BlockSpec((1, W * FM), lambda i: (0, 0)),               # conv1 bias
            pl.BlockSpec((H * W * FM, LM), lambda i: (0, 0)),          # lin0 w
            pl.BlockSpec((1, LM), lambda i: (0, 0)),                   # lin0 b
            pl.BlockSpec((LM, 2 * OUTP), lambda i: (0, 0)),            # lin1 w
            pl.BlockSpec((1, 2 * OUTP), lambda i: (0, 0)),             # lin1 b
        ],
        out_specs=(pl.BlockSpec((B, OUTP), lambda i: (0, 0)),
                   pl.BlockSpec((B, OUTP), lambda i: (0, 0))),
        compiler_params=pltpu.CompilerParams(
            dimension_semantics=("arbitrary",)),
    )(x, q["w0"], q["b0"], q["w1"], q["b1"],
      q["wl0"], q["bl0"], q["wl1"], q["bl1"])
    return probs_pad[:, :A], value_pad[:, :1]


@jax.jit
def forward_av(state_nchw, packed):
    return _fused_forward(state_nchw, packed)


@jax.jit
def forward_a(state_nchw, packed):
    # .squeeze(0) in the torch code is a no-op for batch > 1.
    return _fused_forward(state_nchw, packed)[0]


@jax.jit
def forward_v(state_nchw, packed):
    return _fused_forward(state_nchw, packed)[1]


# TODO(synk): act()/evaluate() (Categorical sampling, log_prob, entropy, memory
# side effects) are host-side policy logic with no Pallas hot path; not kernelized.


# ---------------------------------------------------------------------------
# One-time parameter packing (outside the hot path)
# ---------------------------------------------------------------------------
def pack_params(p):
    eyeW = jnp.eye(W, dtype=jnp.float32)

    def conv0_taps(wa, wv):
        # per tap: (C, 2F) = [actor | critic], then block-diag over W via kron
        taps = []
        for ky in range(3):
            for kx in range(3):
                wt = jnp.concatenate([wa[:, :, ky, kx].T, wv[:, :, ky, kx].T], axis=1)
                taps.append(jnp.kron(eyeW, wt))            # (W*C, W*FM)
        return jnp.stack(taps)                             # (9, W*C, W*FM)

    def conv1_taps(wa, wv):
        # per tap: (2F, 2F) block-diag across branches, then block-diag over W
        taps = []
        for ky in range(3):
            for kx in range(3):
                blk = jnp.zeros((FM, FM), jnp.float32)
                blk = blk.at[:F, :F].set(wa[:, :, ky, kx].T)
                blk = blk.at[F:, F:].set(wv[:, :, ky, kx].T)
                taps.append(jnp.kron(eyeW, blk))           # (W*FM, W*FM)
        return jnp.stack(taps)                             # (9, W*FM, W*FM)

    def conv_bias(ba, bv):
        # lane index = w*FM + ch  ->  bias[ch]
        return jnp.tile(jnp.concatenate([ba, bv]), (W,)).reshape(1, W * FM)

    def lin0_pack(wa, wv):
        # torch flat index: f*HW + h*W + w ; kernel flat index: h*(W*FM) + w*FM + ch
        a_t = jnp.transpose(wa.reshape(L, F, H, W), (2, 3, 1, 0))   # (H, W, F, L)
        v_t = jnp.transpose(wv.reshape(L, F, H, W), (2, 3, 1, 0))
        big = jnp.zeros((H, W, FM, LM), jnp.float32)
        big = big.at[:, :, :F, :L].set(a_t)
        big = big.at[:, :, F:, L:].set(v_t)
        return big.reshape(H * W * FM, LM)                 # (1024, 64)

    def lin1_pack(wa, ba, wv, bv):
        wm = jnp.zeros((LM, 2 * OUTP), jnp.float32)
        wm = wm.at[:L, :A].set(wa.T)                       # actor head -> lanes 0..A-1
        wm = wm.at[L:, OUTP:OUTP + 1].set(wv.T)            # critic head -> lane OUTP
        bm = jnp.zeros((1, 2 * OUTP), jnp.float32)
        bm = bm.at[0, A:OUTP].set(-1e9)                    # softmax mask for padded lanes
        bm = bm.at[0, :A].set(ba)
        bm = bm.at[0, OUTP].set(bv[0])
        return wm, bm

    wl1, bl1 = lin1_pack(p["linear_a_1_w"], p["linear_a_1_b"],
                         p["linear_v_1_w"], p["linear_v_1_b"])
    return dict(
        w0=conv0_taps(p["conv_a_0_w"], p["conv_v_0_w"]),
        b0=conv_bias(p["conv_a_0_b"], p["conv_v_0_b"]),
        w1=conv1_taps(p["conv_a_1_w"], p["conv_v_1_w"]),
        b1=conv_bias(p["conv_a_1_b"], p["conv_v_1_b"]),
        wl0=lin0_pack(p["linear_a_0_w"], p["linear_v_0_w"]),
        bl0=jnp.concatenate([p["linear_a_0_b"], p["linear_v_0_b"]]).reshape(1, LM),
        wl1=wl1, bl1=bl1,
    )


# ---------------------------------------------------------------------------
# Pure-JAX reference (circular pad + XLA conv) for a correctness check
# ---------------------------------------------------------------------------
def _ref_conv_circ(x, w, b):
    xp = jnp.pad(x, ((0, 0), (0, 0), (1, 1), (1, 1)), mode="wrap")
    out = jax.lax.conv_general_dilated(xp, w, window_strides=(1, 1), padding="VALID",
                                       dimension_numbers=("NCHW", "OIHW", "NCHW"))
    return out + b.reshape(1, -1, 1, 1)


def _ref_forward(state, p, branch):
    x = jax.nn.relu(_ref_conv_circ(state, p[f"conv_{branch}_0_w"], p[f"conv_{branch}_0_b"]))
    x = jax.nn.relu(_ref_conv_circ(x, p[f"conv_{branch}_1_w"], p[f"conv_{branch}_1_b"]))
    x = x.reshape(B, -1)
    x = jax.nn.relu(x @ p[f"linear_{branch}_0_w"].T + p[f"linear_{branch}_0_b"])
    out = x @ p[f"linear_{branch}_1_w"].T + p[f"linear_{branch}_1_b"]
    return jax.nn.softmax(out, axis=-1) if branch == "a" else out


# ---------------------------------------------------------------------------
# main
# ---------------------------------------------------------------------------
def _init_params(key):
    names_shapes = [
        ("conv_a_0_w", (F, C, 3, 3)), ("conv_a_0_b", (F,)),
        ("conv_a_1_w", (F, F, 3, 3)), ("conv_a_1_b", (F,)),
        ("linear_a_0_w", (L, D)),     ("linear_a_0_b", (L,)),
        ("linear_a_1_w", (A, L)),     ("linear_a_1_b", (A,)),
        ("conv_v_0_w", (F, C, 3, 3)), ("conv_v_0_b", (F,)),
        ("conv_v_1_w", (F, F, 3, 3)), ("conv_v_1_b", (F,)),
        ("linear_v_0_w", (L, D)),     ("linear_v_0_b", (L,)),
        ("linear_v_1_w", (1, L)),     ("linear_v_1_b", (1,)),
    ]
    keys = jax.random.split(key, len(names_shapes))
    return {name: 0.1 * jax.random.normal(k, shape, dtype=jnp.float32)
            for (name, shape), k in zip(names_shapes, keys)}


if __name__ == "__main__":
    root = jax.random.PRNGKey(0)
    k_state, k_params = jax.random.split(root)
    state_bs = jax.random.normal(k_state, (B, C, H, W), dtype=jnp.float32)  # NCHW like torch
    params = _init_params(k_params)
    packed = pack_params(params)       # one-time weight repacking (layout folded in)

    probs, value = jax.block_until_ready(forward_av(state_bs, packed))
    probs_a = jax.block_until_ready(forward_a(state_bs, packed))
    value_v = jax.block_until_ready(forward_v(state_bs, packed))

    ref_probs = _ref_forward(state_bs, params, "a")
    ref_value = _ref_forward(state_bs, params, "v")

    assert probs.shape == (B, A) and value.shape == (B, 1)
    assert jnp.allclose(probs, probs_a) and jnp.allclose(value, value_v)
    assert jnp.allclose(probs, ref_probs, rtol=2e-3, atol=5e-4)
    assert jnp.allclose(value, ref_value, rtol=2e-3, atol=5e-4)
    assert jnp.allclose(jnp.sum(probs, axis=-1), 1.0, atol=1e-4)   # exact-divide softmax

    print("KERNEL_OK")
</pallas_src>

<mosaic_0001>
module attributes {stable_mosaic.version = 11 : i64} {
  func.func @actor_critic_kernel(%arg0: i32, %arg1: memref<2x8x32xf32, #tpu.memory_space<vmem>>, %arg2: memref<9x32x128xf32, #tpu.memory_space<vmem>>, %arg3: memref<1x128xf32, #tpu.memory_space<vmem>>, %arg4: memref<9x128x128xf32, #tpu.memory_space<vmem>>, %arg5: memref<1x128xf32, #tpu.memory_space<vmem>>, %arg6: memref<1024x64xf32, #tpu.memory_space<vmem>>, %arg7: memref<1x64xf32, #tpu.memory_space<vmem>>, %arg8: memref<64x256xf32, #tpu.memory_space<vmem>>, %arg9: memref<1x256xf32, #tpu.memory_space<vmem>>, %arg10: memref<2x128xf32, #tpu.memory_space<vmem>>, %arg11: memref<2x128xf32, #tpu.memory_space<vmem>>) attributes {dimension_semantics = [#tpu.dimension_semantics<arbitrary>], iteration_bounds = array<i64: 1>, scalar_prefetch = 0 : i64, scratch_operands = 0 : i64, tpu.core_type = #tpu.core_type<tc>, window_params = [{pipeline_mode = #tpu.pipeline_mode<synchronous>, transform_indices = @transform_0, window_bounds = array<i64: 2, 8, 32>}, {pipeline_mode = #tpu.pipeline_mode<synchronous>, transform_indices = @transform_1, window_bounds = array<i64: 9, 32, 128>}, {pipeline_mode = #tpu.pipeline_mode<synchronous>, transform_indices = @transform_2, window_bounds = array<i64: 1, 128>}, {pipeline_mode = #tpu.pipeline_mode<synchronous>, transform_indices = @transform_3, window_bounds = array<i64: 9, 128, 128>}, {pipeline_mode = #tpu.pipeline_mode<synchronous>, transform_indices = @transform_4, window_bounds = array<i64: 1, 128>}, {pipeline_mode = #tpu.pipeline_mode<synchronous>, transform_indices = @transform_5, window_bounds = array<i64: 1024, 64>}, {pipeline_mode = #tpu.pipeline_mode<synchronous>, transform_indices = @transform_6, window_bounds = array<i64: 1, 64>}, {pipeline_mode = #tpu.pipeline_mode<synchronous>, transform_indices = @transform_7, window_bounds = array<i64: 64, 256>}, {pipeline_mode = #tpu.pipeline_mode<synchronous>, transform_indices = @transform_8, window_bounds = array<i64: 1, 256>}, {pipeline_mode = #tpu.pipeline_mode<synchronous>, transform_indices = @transform_9, window_bounds = array<i64: 2, 128>}, {pipeline_mode = #tpu.pipeline_mode<synchronous>, transform_indices = @transform_10, window_bounds = array<i64: 2, 128>}]} {
    %c0 = arith.constant 0 : index
    %c0_0 = arith.constant 0 : index
    %c0_1 = arith.constant 0 : index
    %0 = vector.load %arg1[%c0, %c0_0, %c0_1] : memref<2x8x32xf32, #tpu.memory_space<vmem>>, vector<2x8x32xf32>
    %1 = vector.extract_strided_slice %0 {offsets = [0, 7, 0], sizes = [2, 1, 32], strides = [1, 1, 1]} : vector<2x8x32xf32> to vector<2x1x32xf32>
    %2 = vector.extract_strided_slice %0 {offsets = [0, 0, 0], sizes = [2, 7, 32], strides = [1, 1, 1]} : vector<2x8x32xf32> to vector<2x7x32xf32>
    %3 = tpu.concatenate %1, %2 in 1 : vector<2x1x32xf32>, vector<2x7x32xf32> -> vector<2x8x32xf32>
    %4 = vector.extract_strided_slice %3 {offsets = [0, 0, 28], sizes = [2, 8, 4], strides = [1, 1, 1]} : vector<2x8x32xf32> to vector<2x8x4xf32>
    %5 = vector.extract_strided_slice %3 {offsets = [0, 0, 0], sizes = [2, 8, 28], strides = [1, 1, 1]} : vector<2x8x32xf32> to vector<2x8x28xf32>
    %6 = tpu.concatenate %4, %5 in 2 : vector<2x8x4xf32>, vector<2x8x28xf32> -> vector<2x8x32xf32>
    %7 = vector.shape_cast %6 : vector<2x8x32xf32> to vector<16x32xf32>
    %c0_2 = arith.constant 0 : index
    %c0_3 = arith.constant 0 : index
    %c0_4 = arith.constant 0 : index
    %8 = vector.load %arg2[%c0_2, %c0_3, %c0_4] : memref<9x32x128xf32, #tpu.memory_space<vmem>>, vector<1x32x128xf32>
    %9 = vector.shape_cast %8 : vector<1x32x128xf32> to vector<32x128xf32>
    %cst = arith.constant dense<0.000000e+00> : vector<16x128xf32>
    %10 = tpu.matmul %7, %9, %cst {dimension_numbers = #tpu.dot_dimension_numbers<[1], [0], [0], [1], [0, 0, 1, 1], [], []>} : vector<16x32xf32>, vector<32x128xf32>, vector<16x128xf32> -> vector<16x128xf32>
    %11 = vector.extract_strided_slice %0 {offsets = [0, 7, 0], sizes = [2, 1, 32], strides = [1, 1, 1]} : vector<2x8x32xf32> to vector<2x1x32xf32>
    %12 = vector.extract_strided_slice %0 {offsets = [0, 0, 0], sizes = [2, 7, 32], strides = [1, 1, 1]} : vector<2x8x32xf32> to vector<2x7x32xf32>
    %13 = tpu.concatenate %11, %12 in 1 : vector<2x1x32xf32>, vector<2x7x32xf32> -> vector<2x8x32xf32>
    %14 = vector.shape_cast %13 : vector<2x8x32xf32> to vector<16x32xf32>
    %c1 = arith.constant 1 : index
    %c0_5 = arith.constant 0 : index
    %c0_6 = arith.constant 0 : index
    %15 = vector.load %arg2[%c1, %c0_5, %c0_6] : memref<9x32x128xf32, #tpu.memory_space<vmem>>, vector<1x32x128xf32>
    %16 = vector.shape_cast %15 : vector<1x32x128xf32> to vector<32x128xf32>
    %cst_7 = arith.constant dense<0.000000e+00> : vector<16x128xf32>
    %17 = tpu.matmul %14, %16, %cst_7 {dimension_numbers = #tpu.dot_dimension_numbers<[1], [0], [0], [1], [0, 0, 1, 1], [], []>} : vector<16x32xf32>, vector<32x128xf32>, vector<16x128xf32> -> vector<16x128xf32>
    %18 = arith.addf %10, %17 : vector<16x128xf32>
    %19 = vector.extract_strided_slice %0 {offsets = [0, 7, 0], sizes = [2, 1, 32], strides = [1, 1, 1]} : vector<2x8x32xf32> to vector<2x1x32xf32>
    %20 = vector.extract_strided_slice %0 {offsets = [0, 0, 0], sizes = [2, 7, 32], strides = [1, 1, 1]} : vector<2x8x32xf32> to vector<2x7x32xf32>
    %21 = tpu.concatenate %19, %20 in 1 : vector<2x1x32xf32>, vector<2x7x32xf32> -> vector<2x8x32xf32>
    %22 = vector.extract_strided_slice %21 {offsets = [0, 0, 4], sizes = [2, 8, 28], strides = [1, 1, 1]} : vector<2x8x32xf32> to vector<2x8x28xf32>
    %23 = vector.extract_strided_slice %21 {offsets = [0, 0, 0], sizes = [2, 8, 4], strides = [1, 1, 1]} : vector<2x8x32xf32> to vector<2x8x4xf32>
    %24 = tpu.concatenate %22, %23 in 2 : vector<2x8x28xf32>, vector<2x8x4xf32> -> vector<2x8x32xf32>
    %25 = vector.shape_cast %24 : vector<2x8x32xf32> to vector<16x32xf32>
    %c2 = arith.constant 2 : index
    %c0_8 = arith.constant 0 : index
    %c0_9 = arith.constant 0 : index
    %26 = vector.load %arg2[%c2, %c0_8, %c0_9] : memref<9x32x128xf32, #tpu.memory_space<vmem>>, vector<1x32x128xf32>
    %27 = vector.shape_cast %26 : vector<1x32x128xf32> to vector<32x128xf32>
    %cst_10 = arith.constant dense<0.000000e+00> : vector<16x128xf32>
    %28 = tpu.matmul %25, %27, %cst_10 {dimension_numbers = #tpu.dot_dimension_numbers<[1], [0], [0], [1], [0, 0, 1, 1], [], []>} : vector<16x32xf32>, vector<32x128xf32>, vector<16x128xf32> -> vector<16x128xf32>
    %29 = arith.addf %18, %28 : vector<16x128xf32>
    %30 = vector.extract_strided_slice %0 {offsets = [0, 0, 28], sizes = [2, 8, 4], strides = [1, 1, 1]} : vector<2x8x32xf32> to vector<2x8x4xf32>
    %31 = vector.extract_strided_slice %0 {offsets = [0, 0, 0], sizes = [2, 8, 28], strides = [1, 1, 1]} : vector<2x8x32xf32> to vector<2x8x28xf32>
    %32 = tpu.concatenate %30, %31 in 2 : vector<2x8x4xf32>, vector<2x8x28xf32> -> vector<2x8x32xf32>
    %33 = vector.shape_cast %32 : vector<2x8x32xf32> to vector<16x32xf32>
    %c3 = arith.constant 3 : index
    %c0_11 = arith.constant 0 : index
    %c0_12 = arith.constant 0 : index
    %34 = vector.load %arg2[%c3, %c0_11, %c0_12] : memref<9x32x128xf32, #tpu.memory_space<vmem>>, vector<1x32x128xf32>
    %35 = vector.shape_cast %34 : vector<1x32x128xf32> to vector<32x128xf32>
    %cst_13 = arith.constant dense<0.000000e+00> : vector<16x128xf32>
    %36 = tpu.matmul %33, %35, %cst_13 {dimension_numbers = #tpu.dot_dimension_numbers<[1], [0], [0], [1], [0, 0, 1, 1], [], []>} : vector<16x32xf32>, vector<32x128xf32>, vector<16x128xf32> -> vector<16x128xf32>
    %37 = arith.addf %29, %36 : vector<16x128xf32>
    %38 = vector.shape_cast %0 : vector<2x8x32xf32> to vector<16x32xf32>
    %c4 = arith.constant 4 : index
    %c0_14 = arith.constant 0 : index
    %c0_15 = arith.constant 0 : index
    %39 = vector.load %arg2[%c4, %c0_14, %c0_15] : memref<9x32x128xf32, #tpu.memory_space<vmem>>, vector<1x32x128xf32>
    %40 = vector.shape_cast %39 : vector<1x32x128xf32> to vector<32x128xf32>
    %cst_16 = arith.constant dense<0.000000e+00> : vector<16x128xf32>
    %41 = tpu.matmul %38, %40, %cst_16 {dimension_numbers = #tpu.dot_dimension_numbers<[1], [0], [0], [1], [0, 0, 1, 1], [], []>} : vector<16x32xf32>, vector<32x128xf32>, vector<16x128xf32> -> vector<16x128xf32>
    %42 = arith.addf %37, %41 : vector<16x128xf32>
    %43 = vector.extract_strided_slice %0 {offsets = [0, 0, 4], sizes = [2, 8, 28], strides = [1, 1, 1]} : vector<2x8x32xf32> to vector<2x8x28xf32>
    %44 = vector.extract_strided_slice %0 {offsets = [0, 0, 0], sizes = [2, 8, 4], strides = [1, 1, 1]} : vector<2x8x32xf32> to vector<2x8x4xf32>
    %45 = tpu.concatenate %43, %44 in 2 : vector<2x8x28xf32>, vector<2x8x4xf32> -> vector<2x8x32xf32>
    %46 = vector.shape_cast %45 : vector<2x8x32xf32> to vector<16x32xf32>
    %c5 = arith.constant 5 : index
    %c0_17 = arith.constant 0 : index
    %c0_18 = arith.constant 0 : index
    %47 = vector.load %arg2[%c5, %c0_17, %c0_18] : memref<9x32x128xf32, #tpu.memory_space<vmem>>, vector<1x32x128xf32>
    %48 = vector.shape_cast %47 : vector<1x32x128xf32> to vector<32x128xf32>
    %cst_19 = arith.constant dense<0.000000e+00> : vector<16x128xf32>
    %49 = tpu.matmul %46, %48, %cst_19 {dimension_numbers = #tpu.dot_dimension_numbers<[1], [0], [0], [1], [0, 0, 1, 1], [], []>} : vector<16x32xf32>, vector<32x128xf32>, vector<16x128xf32> -> vector<16x128xf32>
    %50 = arith.addf %42, %49 : vector<16x128xf32>
    %51 = vector.extract_strided_slice %0 {offsets = [0, 1, 0], sizes = [2, 7, 32], strides = [1, 1, 1]} : vector<2x8x32xf32> to vector<2x7x32xf32>
    %52 = vector.extract_strided_slice %0 {offsets = [0, 0, 0], sizes = [2, 1, 32], strides = [1, 1, 1]} : vector<2x8x32xf32> to vector<2x1x32xf32>
    %53 = tpu.concatenate %51, %52 in 1 : vector<2x7x32xf32>, vector<2x1x32xf32> -> vector<2x8x32xf32>
    %54 = vector.extract_strided_slice %53 {offsets = [0, 0, 28], sizes = [2, 8, 4], strides = [1, 1, 1]} : vector<2x8x32xf32> to vector<2x8x4xf32>
    %55 = vector.extract_strided_slice %53 {offsets = [0, 0, 0], sizes = [2, 8, 28], strides = [1, 1, 1]} : vector<2x8x32xf32> to vector<2x8x28xf32>
    %56 = tpu.concatenate %54, %55 in 2 : vector<2x8x4xf32>, vector<2x8x28xf32> -> vector<2x8x32xf32>
    %57 = vector.shape_cast %56 : vector<2x8x32xf32> to vector<16x32xf32>
    %c6 = arith.constant 6 : index
    %c0_20 = arith.constant 0 : index
    %c0_21 = arith.constant 0 : index
    %58 = vector.load %arg2[%c6, %c0_20, %c0_21] : memref<9x32x128xf32, #tpu.memory_space<vmem>>, vector<1x32x128xf32>
    %59 = vector.shape_cast %58 : vector<1x32x128xf32> to vector<32x128xf32>
    %cst_22 = arith.constant dense<0.000000e+00> : vector<16x128xf32>
    %60 = tpu.matmul %57, %59, %cst_22 {dimension_numbers = #tpu.dot_dimension_numbers<[1], [0], [0], [1], [0, 0, 1, 1], [], []>} : vector<16x32xf32>, vector<32x128xf32>, vector<16x128xf32> -> vector<16x128xf32>
    %61 = arith.addf %50, %60 : vector<16x128xf32>
    %62 = vector.extract_strided_slice %0 {offsets = [0, 1, 0], sizes = [2, 7, 32], strides = [1, 1, 1]} : vector<2x8x32xf32> to vector<2x7x32xf32>
    %63 = vector.extract_strided_slice %0 {offsets = [0, 0, 0], sizes = [2, 1, 32], strides = [1, 1, 1]} : vector<2x8x32xf32> to vector<2x1x32xf32>
    %64 = tpu.concatenate %62, %63 in 1 : vector<2x7x32xf32>, vector<2x1x32xf32> -> vector<2x8x32xf32>
    %65 = vector.shape_cast %64 : vector<2x8x32xf32> to vector<16x32xf32>
    %c7 = arith.constant 7 : index
    %c0_23 = arith.constant 0 : index
    %c0_24 = arith.constant 0 : index
    %66 = vector.load %arg2[%c7, %c0_23, %c0_24] : memref<9x32x128xf32, #tpu.memory_space<vmem>>, vector<1x32x128xf32>
    %67 = vector.shape_cast %66 : vector<1x32x128xf32> to vector<32x128xf32>
    %cst_25 = arith.constant dense<0.000000e+00> : vector<16x128xf32>
    %68 = tpu.matmul %65, %67, %cst_25 {dimension_numbers = #tpu.dot_dimension_numbers<[1], [0], [0], [1], [0, 0, 1, 1], [], []>} : vector<16x32xf32>, vector<32x128xf32>, vector<16x128xf32> -> vector<16x128xf32>
    %69 = arith.addf %61, %68 : vector<16x128xf32>
    %70 = vector.extract_strided_slice %0 {offsets = [0, 1, 0], sizes = [2, 7, 32], strides = [1, 1, 1]} : vector<2x8x32xf32> to vector<2x7x32xf32>
    %71 = vector.extract_strided_slice %0 {offsets = [0, 0, 0], sizes = [2, 1, 32], strides = [1, 1, 1]} : vector<2x8x32xf32> to vector<2x1x32xf32>
    %72 = tpu.concatenate %70, %71 in 1 : vector<2x7x32xf32>, vector<2x1x32xf32> -> vector<2x8x32xf32>
    %73 = vector.extract_strided_slice %72 {offsets = [0, 0, 4], sizes = [2, 8, 28], strides = [1, 1, 1]} : vector<2x8x32xf32> to vector<2x8x28xf32>
    %74 = vector.extract_strided_slice %72 {offsets = [0, 0, 0], sizes = [2, 8, 4], strides = [1, 1, 1]} : vector<2x8x32xf32> to vector<2x8x4xf32>
    %75 = tpu.concatenate %73, %74 in 2 : vector<2x8x28xf32>, vector<2x8x4xf32> -> vector<2x8x32xf32>
    %76 = vector.shape_cast %75 : vector<2x8x32xf32> to vector<16x32xf32>
    %c8 = arith.constant 8 : index
    %c0_26 = arith.constant 0 : index
    %c0_27 = arith.constant 0 : index
    %77 = vector.load %arg2[%c8, %c0_26, %c0_27] : memref<9x32x128xf32, #tpu.memory_space<vmem>>, vector<1x32x128xf32>
    %78 = vector.shape_cast %77 : vector<1x32x128xf32> to vector<32x128xf32>
    %cst_28 = arith.constant dense<0.000000e+00> : vector<16x128xf32>
    %79 = tpu.matmul %76, %78, %cst_28 {dimension_numbers = #tpu.dot_dimension_numbers<[1], [0], [0], [1], [0, 0, 1, 1], [], []>} : vector<16x32xf32>, vector<32x128xf32>, vector<16x128xf32> -> vector<16x128xf32>
    %80 = arith.addf %69, %79 : vector<16x128xf32>
    %c0_29 = arith.constant 0 : index
    %c0_30 = arith.constant 0 : index
    %81 = vector.load %arg3[%c0_29, %c0_30] : memref<1x128xf32, #tpu.memory_space<vmem>>, vector<1x128xf32>
    %82 = vector.broadcast %81 : vector<1x128xf32> to vector<16x128xf32>
    %83 = arith.addf %80, %82 : vector<16x128xf32>
    %cst_31 = arith.constant 0.000000e+00 : f32
    %84 = vector.broadcast %cst_31 : f32 to vector<16x128xf32>
    %85 = arith.maximumf %83, %84 : vector<16x128xf32>
    %86 = vector.shape_cast %85 : vector<16x128xf32> to vector<2x8x128xf32>
    %87 = vector.extract_strided_slice %86 {offsets = [0, 7, 0], sizes = [2, 1, 128], strides = [1, 1, 1]} : vector<2x8x128xf32> to vector<2x1x128xf32>
    %88 = vector.extract_strided_slice %86 {offsets = [0, 0, 0], sizes = [2, 7, 128], strides = [1, 1, 1]} : vector<2x8x128xf32> to vector<2x7x128xf32>
    %89 = tpu.concatenate %87, %88 in 1 : vector<2x1x128xf32>, vector<2x7x128xf32> -> vector<2x8x128xf32>
    %90 = vector.extract_strided_slice %89 {offsets = [0, 0, 112], sizes = [2, 8, 16], strides = [1, 1, 1]} : vector<2x8x128xf32> to vector<2x8x16xf32>
    %91 = vector.extract_strided_slice %89 {offsets = [0, 0, 0], sizes = [2, 8, 112], strides = [1, 1, 1]} : vector<2x8x128xf32> to vector<2x8x112xf32>
    %92 = tpu.concatenate %90, %91 in 2 : vector<2x8x16xf32>, vector<2x8x112xf32> -> vector<2x8x128xf32>
    %93 = vector.shape_cast %92 : vector<2x8x128xf32> to vector<16x128xf32>
    %c0_32 = arith.constant 0 : index
    %c0_33 = arith.constant 0 : index
    %c0_34 = arith.constant 0 : index
    %94 = vector.load %arg4[%c0_32, %c0_33, %c0_34] : memref<9x128x128xf32, #tpu.memory_space<vmem>>, vector<1x128x128xf32>
    %95 = vector.shape_cast %94 : vector<1x128x128xf32> to vector<128x128xf32>
    %cst_35 = arith.constant dense<0.000000e+00> : vector<16x128xf32>
    %96 = tpu.matmul %93, %95, %cst_35 {dimension_numbers = #tpu.dot_dimension_numbers<[1], [0], [0], [1], [0, 0, 1, 1], [], []>} : vector<16x128xf32>, vector<128x128xf32>, vector<16x128xf32> -> vector<16x128xf32>
    %97 = vector.extract_strided_slice %86 {offsets = [0, 7, 0], sizes = [2, 1, 128], strides = [1, 1, 1]} : vector<2x8x128xf32> to vector<2x1x128xf32>
    %98 = vector.extract_strided_slice %86 {offsets = [0, 0, 0], sizes = [2, 7, 128], strides = [1, 1, 1]} : vector<2x8x128xf32> to vector<2x7x128xf32>
    %99 = tpu.concatenate %97, %98 in 1 : vector<2x1x128xf32>, vector<2x7x128xf32> -> vector<2x8x128xf32>
    %100 = vector.shape_cast %99 : vector<2x8x128xf32> to vector<16x128xf32>
    %c1_36 = arith.constant 1 : index
    %c0_37 = arith.constant 0 : index
    %c0_38 = arith.constant 0 : index
    %101 = vector.load %arg4[%c1_36, %c0_37, %c0_38] : memref<9x128x128xf32, #tpu.memory_space<vmem>>, vector<1x128x128xf32>
    %102 = vector.shape_cast %101 : vector<1x128x128xf32> to vector<128x128xf32>
    %cst_39 = arith.constant dense<0.000000e+00> : vector<16x128xf32>
    %103 = tpu.matmul %100, %102, %cst_39 {dimension_numbers = #tpu.dot_dimension_numbers<[1], [0], [0], [1], [0, 0, 1, 1], [], []>} : vector<16x128xf32>, vector<128x128xf32>, vector<16x128xf32> -> vector<16x128xf32>
    %104 = arith.addf %96, %103 : vector<16x128xf32>
    %105 = vector.extract_strided_slice %86 {offsets = [0, 7, 0], sizes = [2, 1, 128], strides = [1, 1, 1]} : vector<2x8x128xf32> to vector<2x1x128xf32>
    %106 = vector.extract_strided_slice %86 {offsets = [0, 0, 0], sizes = [2, 7, 128], strides = [1, 1, 1]} : vector<2x8x128xf32> to vector<2x7x128xf32>
    %107 = tpu.concatenate %105, %106 in 1 : vector<2x1x128xf32>, vector<2x7x128xf32> -> vector<2x8x128xf32>
    %108 = vector.extract_strided_slice %107 {offsets = [0, 0, 16], sizes = [2, 8, 112], strides = [1, 1, 1]} : vector<2x8x128xf32> to vector<2x8x112xf32>
    %109 = vector.extract_strided_slice %107 {offsets = [0, 0, 0], sizes = [2, 8, 16], strides = [1, 1, 1]} : vector<2x8x128xf32> to vector<2x8x16xf32>
    %110 = tpu.concatenate %108, %109 in 2 : vector<2x8x112xf32>, vector<2x8x16xf32> -> vector<2x8x128xf32>
    %111 = vector.shape_cast %110 : vector<2x8x128xf32> to vector<16x128xf32>
    %c2_40 = arith.constant 2 : index
    %c0_41 = arith.constant 0 : index
    %c0_42 = arith.constant 0 : index
    %112 = vector.load %arg4[%c2_40, %c0_41, %c0_42] : memref<9x128x128xf32, #tpu.memory_space<vmem>>, vector<1x128x128xf32>
    %113 = vector.shape_cast %112 : vector<1x128x128xf32> to vector<128x128xf32>
    %cst_43 = arith.constant dense<0.000000e+00> : vector<16x128xf32>
    %114 = tpu.matmul %111, %113, %cst_43 {dimension_numbers = #tpu.dot_dimension_numbers<[1], [0], [0], [1], [0, 0, 1, 1], [], []>} : vector<16x128xf32>, vector<128x128xf32>, vector<16x128xf32> -> vector<16x128xf32>
    %115 = arith.addf %104, %114 : vector<16x128xf32>
    %116 = vector.extract_strided_slice %86 {offsets = [0, 0, 112], sizes = [2, 8, 16], strides = [1, 1, 1]} : vector<2x8x128xf32> to vector<2x8x16xf32>
    %117 = vector.extract_strided_slice %86 {offsets = [0, 0, 0], sizes = [2, 8, 112], strides = [1, 1, 1]} : vector<2x8x128xf32> to vector<2x8x112xf32>
    %118 = tpu.concatenate %116, %117 in 2 : vector<2x8x16xf32>, vector<2x8x112xf32> -> vector<2x8x128xf32>
    %119 = vector.shape_cast %118 : vector<2x8x128xf32> to vector<16x128xf32>
    %c3_44 = arith.constant 3 : index
    %c0_45 = arith.constant 0 : index
    %c0_46 = arith.constant 0 : index
    %120 = vector.load %arg4[%c3_44, %c0_45, %c0_46] : memref<9x128x128xf32, #tpu.memory_space<vmem>>, vector<1x128x128xf32>
    %121 = vector.shape_cast %120 : vector<1x128x128xf32> to vector<128x128xf32>
    %cst_47 = arith.constant dense<0.000000e+00> : vector<16x128xf32>
    %122 = tpu.matmul %119, %121, %cst_47 {dimension_numbers = #tpu.dot_dimension_numbers<[1], [0], [0], [1], [0, 0, 1, 1], [], []>} : vector<16x128xf32>, vector<128x128xf32>, vector<16x128xf32> -> vector<16x128xf32>
    %123 = arith.addf %115, %122 : vector<16x128xf32>
    %124 = vector.shape_cast %86 : vector<2x8x128xf32> to vector<16x128xf32>
    %c4_48 = arith.constant 4 : index
    %c0_49 = arith.constant 0 : index
    %c0_50 = arith.constant 0 : index
    %125 = vector.load %arg4[%c4_48, %c0_49, %c0_50] : memref<9x128x128xf32, #tpu.memory_space<vmem>>, vector<1x128x128xf32>
    %126 = vector.shape_cast %125 : vector<1x128x128xf32> to vector<128x128xf32>
    %cst_51 = arith.constant dense<0.000000e+00> : vector<16x128xf32>
    %127 = tpu.matmul %124, %126, %cst_51 {dimension_numbers = #tpu.dot_dimension_numbers<[1], [0], [0], [1], [0, 0, 1, 1], [], []>} : vector<16x128xf32>, vector<128x128xf32>, vector<16x128xf32> -> vector<16x128xf32>
    %128 = arith.addf %123, %127 : vector<16x128xf32>
    %129 = vector.extract_strided_slice %86 {offsets = [0, 0, 16], sizes = [2, 8, 112], strides = [1, 1, 1]} : vector<2x8x128xf32> to vector<2x8x112xf32>
    %130 = vector.extract_strided_slice %86 {offsets = [0, 0, 0], sizes = [2, 8, 16], strides = [1, 1, 1]} : vector<2x8x128xf32> to vector<2x8x16xf32>
    %131 = tpu.concatenate %129, %130 in 2 : vector<2x8x112xf32>, vector<2x8x16xf32> -> vector<2x8x128xf32>
    %132 = vector.shape_cast %131 : vector<2x8x128xf32> to vector<16x128xf32>
    %c5_52 = arith.constant 5 : index
    %c0_53 = arith.constant 0 : index
    %c0_54 = arith.constant 0 : index
    %133 = vector.load %arg4[%c5_52, %c0_53, %c0_54] : memref<9x128x128xf32, #tpu.memory_space<vmem>>, vector<1x128x128xf32>
    %134 = vector.shape_cast %133 : vector<1x128x128xf32> to vector<128x128xf32>
    %cst_55 = arith.constant dense<0.000000e+00> : vector<16x128xf32>
    %135 = tpu.matmul %132, %134, %cst_55 {dimension_numbers = #tpu.dot_dimension_numbers<[1], [0], [0], [1], [0, 0, 1, 1], [], []>} : vector<16x128xf32>, vector<128x128xf32>, vector<16x128xf32> -> vector<16x128xf32>
    %136 = arith.addf %128, %135 : vector<16x128xf32>
    %137 = vector.extract_strided_slice %86 {offsets = [0, 1, 0], sizes = [2, 7, 128], strides = [1, 1, 1]} : vector<2x8x128xf32> to vector<2x7x128xf32>
    %138 = vector.extract_strided_slice %86 {offsets = [0, 0, 0], sizes = [2, 1, 128], strides = [1, 1, 1]} : vector<2x8x128xf32> to vector<2x1x128xf32>
    %139 = tpu.concatenate %137, %138 in 1 : vector<2x7x128xf32>, vector<2x1x128xf32> -> vector<2x8x128xf32>
    %140 = vector.extract_strided_slice %139 {offsets = [0, 0, 112], sizes = [2, 8, 16], strides = [1, 1, 1]} : vector<2x8x128xf32> to vector<2x8x16xf32>
    %141 = vector.extract_strided_slice %139 {offsets = [0, 0, 0], sizes = [2, 8, 112], strides = [1, 1, 1]} : vector<2x8x128xf32> to vector<2x8x112xf32>
    %142 = tpu.concatenate %140, %141 in 2 : vector<2x8x16xf32>, vector<2x8x112xf32> -> vector<2x8x128xf32>
    %143 = vector.shape_cast %142 : vector<2x8x128xf32> to vector<16x128xf32>
    %c6_56 = arith.constant 6 : index
    %c0_57 = arith.constant 0 : index
    %c0_58 = arith.constant 0 : index
    %144 = vector.load %arg4[%c6_56, %c0_57, %c0_58] : memref<9x128x128xf32, #tpu.memory_space<vmem>>, vector<1x128x128xf32>
    %145 = vector.shape_cast %144 : vector<1x128x128xf32> to vector<128x128xf32>
    %cst_59 = arith.constant dense<0.000000e+00> : vector<16x128xf32>
    %146 = tpu.matmul %143, %145, %cst_59 {dimension_numbers = #tpu.dot_dimension_numbers<[1], [0], [0], [1], [0, 0, 1, 1], [], []>} : vector<16x128xf32>, vector<128x128xf32>, vector<16x128xf32> -> vector<16x128xf32>
    %147 = arith.addf %136, %146 : vector<16x128xf32>
    %148 = vector.extract_strided_slice %86 {offsets = [0, 1, 0], sizes = [2, 7, 128], strides = [1, 1, 1]} : vector<2x8x128xf32> to vector<2x7x128xf32>
    %149 = vector.extract_strided_slice %86 {offsets = [0, 0, 0], sizes = [2, 1, 128], strides = [1, 1, 1]} : vector<2x8x128xf32> to vector<2x1x128xf32>
    %150 = tpu.concatenate %148, %149 in 1 : vector<2x7x128xf32>, vector<2x1x128xf32> -> vector<2x8x128xf32>
    %151 = vector.shape_cast %150 : vector<2x8x128xf32> to vector<16x128xf32>
    %c7_60 = arith.constant 7 : index
    %c0_61 = arith.constant 0 : index
    %c0_62 = arith.constant 0 : index
    %152 = vector.load %arg4[%c7_60, %c0_61, %c0_62] : memref<9x128x128xf32, #tpu.memory_space<vmem>>, vector<1x128x128xf32>
    %153 = vector.shape_cast %152 : vector<1x128x128xf32> to vector<128x128xf32>
    %cst_63 = arith.constant dense<0.000000e+00> : vector<16x128xf32>
    %154 = tpu.matmul %151, %153, %cst_63 {dimension_numbers = #tpu.dot_dimension_numbers<[1], [0], [0], [1], [0, 0, 1, 1], [], []>} : vector<16x128xf32>, vector<128x128xf32>, vector<16x128xf32> -> vector<16x128xf32>
    %155 = arith.addf %147, %154 : vector<16x128xf32>
    %156 = vector.extract_strided_slice %86 {offsets = [0, 1, 0], sizes = [2, 7, 128], strides = [1, 1, 1]} : vector<2x8x128xf32> to vector<2x7x128xf32>
    %157 = vector.extract_strided_slice %86 {offsets = [0, 0, 0], sizes = [2, 1, 128], strides = [1, 1, 1]} : vector<2x8x128xf32> to vector<2x1x128xf32>
    %158 = tpu.concatenate %156, %157 in 1 : vector<2x7x128xf32>, vector<2x1x128xf32> -> vector<2x8x128xf32>
    %159 = vector.extract_strided_slice %158 {offsets = [0, 0, 16], sizes = [2, 8, 112], strides = [1, 1, 1]} : vector<2x8x128xf32> to vector<2x8x112xf32>
    %160 = vector.extract_strided_slice %158 {offsets = [0, 0, 0], sizes = [2, 8, 16], strides = [1, 1, 1]} : vector<2x8x128xf32> to vector<2x8x16xf32>
    %161 = tpu.concatenate %159, %160 in 2 : vector<2x8x112xf32>, vector<2x8x16xf32> -> vector<2x8x128xf32>
    %162 = vector.shape_cast %161 : vector<2x8x128xf32> to vector<16x128xf32>
    %c8_64 = arith.constant 8 : index
    %c0_65 = arith.constant 0 : index
    %c0_66 = arith.constant 0 : index
    %163 = vector.load %arg4[%c8_64, %c0_65, %c0_66] : memref<9x128x128xf32, #tpu.memory_space<vmem>>, vector<1x128x128xf32>
    %164 = vector.shape_cast %163 : vector<1x128x128xf32> to vector<128x128xf32>
    %cst_67 = arith.constant dense<0.000000e+00> : vector<16x128xf32>
    %165 = tpu.matmul %162, %164, %cst_67 {dimension_numbers = #tpu.dot_dimension_numbers<[1], [0], [0], [1], [0, 0, 1, 1], [], []>} : vector<16x128xf32>, vector<128x128xf32>, vector<16x128xf32> -> vector<16x128xf32>
    %166 = arith.addf %155, %165 : vector<16x128xf32>
    %c0_68 = arith.constant 0 : index
    %c0_69 = arith.constant 0 : index
    %167 = vector.load %arg5[%c0_68, %c0_69] : memref<1x128xf32, #tpu.memory_space<vmem>>, vector<1x128xf32>
    %168 = vector.broadcast %167 : vector<1x128xf32> to vector<16x128xf32>
    %169 = arith.addf %166, %168 : vector<16x128xf32>
    %cst_70 = arith.constant 0.000000e+00 : f32
    %170 = vector.broadcast %cst_70 : f32 to vector<16x128xf32>
    %171 = arith.maximumf %169, %170 : vector<16x128xf32>
    %172 = vector.shape_cast %171 : vector<16x128xf32> to vector<2x1024xf32>
    %c0_71 = arith.constant 0 : index
    %c0_72 = arith.constant 0 : index
    %173 = vector.load %arg6[%c0_71, %c0_72] : memref<1024x64xf32, #tpu.memory_space<vmem>>, vector<1024x64xf32>
    %cst_73 = arith.constant dense<0.000000e+00> : vector<2x64xf32>
    %174 = tpu.matmul %172, %173, %cst_73 {dimension_numbers = #tpu.dot_dimension_numbers<[1], [0], [0], [1], [0, 0, 1, 1], [], []>} : vector<2x1024xf32>, vector<1024x64xf32>, vector<2x64xf32> -> vector<2x64xf32>
    %c0_74 = arith.constant 0 : index
    %c0_75 = arith.constant 0 : index
    %175 = vector.load %arg7[%c0_74, %c0_75] : memref<1x64xf32, #tpu.memory_space<vmem>>, vector<1x64xf32>
    %176 = vector.broadcast %175 : vector<1x64xf32> to vector<2x64xf32>
    %177 = arith.addf %174, %176 : vector<2x64xf32>
    %cst_76 = arith.constant 0.000000e+00 : f32
    %178 = vector.broadcast %cst_76 : f32 to vector<2x64xf32>
    %179 = arith.maximumf %177, %178 : vector<2x64xf32>
    %c0_77 = arith.constant 0 : index
    %c0_78 = arith.constant 0 : index
    %180 = vector.load %arg8[%c0_77, %c0_78] : memref<64x256xf32, #tpu.memory_space<vmem>>, vector<64x256xf32>
    %cst_79 = arith.constant dense<0.000000e+00> : vector<2x256xf32>
    %181 = tpu.matmul %179, %180, %cst_79 {dimension_numbers = #tpu.dot_dimension_numbers<[1], [0], [0], [1], [0, 0, 1, 1], [], []>} : vector<2x64xf32>, vector<64x256xf32>, vector<2x256xf32> -> vector<2x256xf32>
    %c0_80 = arith.constant 0 : index
    %c0_81 = arith.constant 0 : index
    %182 = vector.load %arg9[%c0_80, %c0_81] : memref<1x256xf32, #tpu.memory_space<vmem>>, vector<1x256xf32>
    %183 = vector.broadcast %182 : vector<1x256xf32> to vector<2x256xf32>
    %184 = arith.addf %181, %183 : vector<2x256xf32>
    %185 = vector.extract_strided_slice %184 {offsets = [0, 0], sizes = [2, 128], strides = [1, 1]} : vector<2x256xf32> to vector<2x128xf32>
    %cst_82 = arith.constant dense<0xFF800000> : vector<2xf32>
    %186 = vector.multi_reduction <maximumf>, %185, %cst_82 [1] : vector<2x128xf32> to vector<2xf32>
    %187 = vector.shape_cast %186 : vector<2xf32> to vector<2x1xf32>
    %188 = vector.broadcast %187 : vector<2x1xf32> to vector<2x128xf32>
    %189 = arith.subf %185, %188 : vector<2x128xf32>
    %190 = math.exp %189 : vector<2x128xf32>
    %cst_83 = arith.constant dense<0.000000e+00> : vector<2xf32>
    %191 = vector.multi_reduction <add>, %190, %cst_83 [1] : vector<2x128xf32> to vector<2xf32>
    %192 = vector.shape_cast %191 : vector<2xf32> to vector<2x1xf32>
    %193 = vector.broadcast %192 : vector<2x1xf32> to vector<2x128xf32>
    %194 = arith.divf %190, %193 : vector<2x128xf32>
    %c0_84 = arith.constant 0 : index
    %c0_85 = arith.constant 0 : index
    %195 = vector.load %arg10[%c0_84, %c0_85] : memref<2x128xf32, #tpu.memory_space<vmem>>, vector<2x128xf32>
    tpu.vector_store %arg10[%c0_84, %c0_85], %194 {strides = array<i32>} : memref<2x128xf32, #tpu.memory_space<vmem>>, vector<2x128xf32>,
    %196 = vector.extract_strided_slice %184 {offsets = [0, 128], sizes = [2, 128], strides = [1, 1]} : vector<2x256xf32> to vector<2x128xf32>
    %c0_86 = arith.constant 0 : index
    %c0_87 = arith.constant 0 : index
    %197 = vector.load %arg11[%c0_86, %c0_87] : memref<2x128xf32, #tpu.memory_space<vmem>>, vector<2x128xf32>
    tpu.vector_store %arg11[%c0_86, %c0_87], %196 {strides = array<i32>} : memref<2x128xf32, #tpu.memory_space<vmem>>, vector<2x128xf32>,
    return
  }
  func.func @transform_0(%arg0: i32) -> (i32, i32, i32) {
    %c0_i32 = arith.constant 0 : i32
    %c0_i32_0 = arith.constant 0 : i32
    %c0_i32_1 = arith.constant 0 : i32
    %c0_i32_2 = arith.constant 0 : i32
    return %c0_i32, %c0_i32_0, %c0_i32_1 : i32, i32, i32
  }
  func.func @transform_1(%arg0: i32) -> (i32, i32, i32) {
    %c0_i32 = arith.constant 0 : i32
    %c0_i32_0 = arith.constant 0 : i32
    %c0_i32_1 = arith.constant 0 : i32
    %c0_i32_2 = arith.constant 0 : i32
    return %c0_i32, %c0_i32_0, %c0_i32_1 : i32, i32, i32
  }
  func.func @transform_2(%arg0: i32) -> (i32, i32) {
    %c0_i32 = arith.constant 0 : i32
    %c0_i32_0 = arith.constant 0 : i32
    %c0_i32_1 = arith.constant 0 : i32
    return %c0_i32, %c0_i32_0 : i32, i32
  }
  func.func @transform_3(%arg0: i32) -> (i32, i32, i32) {
    %c0_i32 = arith.constant 0 : i32
    %c0_i32_0 = arith.constant 0 : i32
    %c0_i32_1 = arith.constant 0 : i32
    %c0_i32_2 = arith.constant 0 : i32
    return %c0_i32, %c0_i32_0, %c0_i32_1 : i32, i32, i32
  }
  func.func @transform_4(%arg0: i32) -> (i32, i32) {
    %c0_i32 = arith.constant 0 : i32
    %c0_i32_0 = arith.constant 0 : i32
    %c0_i32_1 = arith.constant 0 : i32
    return %c0_i32, %c0_i32_0 : i32, i32
  }
  func.func @transform_5(%arg0: i32) -> (i32, i32) {
    %c0_i32 = arith.constant 0 : i32
    %c0_i32_0 = arith.constant 0 : i32
    %c0_i32_1 = arith.constant 0 : i32
    return %c0_i32, %c0_i32_0 : i32, i32
  }
  func.func @transform_6(%arg0: i32) -> (i32, i32) {
    %c0_i32 = arith.constant 0 : i32
    %c0_i32_0 = arith.constant 0 : i32
    %c0_i32_1 = arith.constant 0 : i32
    return %c0_i32, %c0_i32_0 : i32, i32
  }
  func.func @transform_7(%arg0: i32) -> (i32, i32) {
    %c0_i32 = arith.constant 0 : i32
    %c0_i32_0 = arith.constant 0 : i32
    %c0_i32_1 = arith.constant 0 : i32
    return %c0_i32, %c0_i32_0 : i32, i32
  }
  func.func @transform_8(%arg0: i32) -> (i32, i32) {
    %c0_i32 = arith.constant 0 : i32
    %c0_i32_0 = arith.constant 0 : i32
    %c0_i32_1 = arith.constant 0 : i32
    return %c0_i32, %c0_i32_0 : i32, i32
  }
  func.func @transform_9(%arg0: i32) -> (i32, i32) {
    %c0_i32 = arith.constant 0 : i32
    %c0_i32_0 = arith.constant 0 : i32
    %c0_i32_1 = arith.constant 0 : i32
    return %c0_i32, %c0_i32_0 : i32, i32
  }
  func.func @transform_10(%arg0: i32) -> (i32, i32) {
    %c0_i32 = arith.constant 0 : i32
    %c0_i32_0 = arith.constant 0 : i32
    %c0_i32_1 = arith.constant 0 : i32
    return %c0_i32, %c0_i32_0 : i32, i32
  }
}

</mosaic_0001>

<bundles_post_ra>
// kernel: forward_av.1
= control target key start
LH: loop header
LB: loop body
LE: loop exit
PB: predicated region body
PF: predicated region fallthrough
CT: control target
= control target key end

     0   :  { %s3471_s11 = smov 4   ;;  %s4678_s0 = inlined_call_operand.vmem [shape: f32[2,8,32], index: 0, kind: input, shape index: {}]   ;;  %s4679_s1 = inlined_call_operand.vmem [shape: f32[9,32,128], index: 1, kind: input, shape index: {}]   ;;  %s4680_s2 = inlined_call_operand.vmem [shape: f32[1,128], index: 2, kind: input, shape index: {}]   ;;  %s4681_s3 = inlined_call_operand.vmem [shape: f32[9,128,128], index: 3, kind: input, shape index: {}]   ;;  %s4682_s4 = inlined_call_operand.vmem [shape: f32[1,128], index: 4, kind: input, shape index: {}]   ;;  %s4683_s5 = inlined_call_operand.vmem [shape: f32[1024,64], index: 5, kind: input, shape index: {}]   ;;  %s4684_s6 = inlined_call_operand.vmem [shape: f32[1,64], index: 6, kind: input, shape index: {}]   ;;  %s4685_s7 = inlined_call_operand.vmem [shape: f32[64,256], index: 7, kind: input, shape index: {}]   ;;  %s4686_s8 = inlined_call_operand.vmem [shape: f32[1,256], index: 8, kind: input, shape index: {}]   ;;  %s4687_s9 = inlined_call_operand.hbm [shape: f32[2,128], index: 9, kind: output, shape index: {0}]   ;;  %s4688_s10 = inlined_call_operand.vmem [shape: f32[2,128], index: 10, kind: output, shape index: {1}]  }
   0x1   :  { %v3537_v0 = vld [vmem:[%s4678_s0 + $0x8] sm:$0xff]  ;;  %v3542_v1 = vld [vmem:[%s4678_s0] sm:$0xff]  ;;  %v2456_v2 = vld [vmem:[%s4679_s1 + $0x38] sm:$0xff]  ;;  %s3470_s0 = smov 100  }
   0x2   :  { %v40_v3 = vrot.slane %v3537_v0, 7  ;;  %v39_v4 = vrot.slane %v3542_v1, 7  ;;  %2991 = vmatprep.subr.mxu0 %v2456_v2  ;;  %v66_v5 = vld [vmem:[%s4679_s1 + $0x18] sm:$0xff]  ;;  %v2455_v6 = vld [vmem:[%s4679_s1 + $0x30] sm:$0xff]  ;;  %v2454_v8 = vld [vmem:[%s4679_s1 + $0x28] sm:$0xff] }
   0x3   :  { %2992 = vmatpush3.msra.mxu0 %v2456_v2  ;;  %v65_v7 = vld [vmem:[%s4679_s1 + $0x10] sm:$0xff]  ;;  %3002 = vmatprep.subr.mxu1 %v66_v5  ;;  %v64_v9 = vld [vmem:[%s4679_s1 + $0x8] sm:$0xff]  ;;  %v2453_v10 = vld [vmem:[%s4679_s1 + $0x20] sm:$0xff] }
   0x4   :  { %50 = vrot.lane.b32.xlu1 %v40_v3, %s3470_s0  ;;  %48 = vrot.lane.b32.xlu0 %v39_v4, %s3470_s0 }
   0x5   :  { %2993 = vmatprep.subr.mxu0 %v2455_v6  ;;  %3003 = vmatpush3.msra.mxu1 %v66_v5 }
   0x6   :  { %2994 = vmatpush3.msra.mxu0 %v2455_v6  ;;  %3004 = vmatprep.subr.mxu1 %v65_v7 }
   0x7   :  { %2995 = vmatprep.subr.mxu0 %v2454_v8  ;;  %3005 = vmatpush3.msra.mxu1 %v65_v7 }
   0x8   :  { %56 = vrot.lane.b32.xlu1 %v40_v3, %s3471_s11  ;;  %54 = vrot.lane.b32.xlu0 %v39_v4, %s3471_s11 }
   0x9   :  { %2996 = vmatpush3.msra.mxu0 %v2454_v8 }
   0xa   :  { %16 = vsyncpa [#allocation3], 0  ;;  %3006 = vmatprep.subr.mxu1 %v64_v9  ;;  %2997 = vmatprep.subr.mxu0 %v2453_v10  ;;  %v63_v11 = vld [vmem:[%s4679_s1] sm:$0xff]  ;;  %vm72_vm0 = vcmask 261120   ;;  %v2464_v12 = vld [vmem:[%s4679_s1 + $0x58] sm:$0xff]  ;;  %s3472_s16 = smov 28  }
   0xb   :  { %3007 = vmatpush3.msra.mxu1 %v64_v9  ;;  %2998 = vmatpush3.msra.mxu0 %v2453_v10  ;;  %s3473_s17 = smov 124   ;;  %v2470_v13 = vld [vmem:[%s4679_s1 + $0x78] sm:$0xff]  ;;  %v2463_v14 = vld [vmem:[%s4679_s1 + $0x50] sm:$0xff]  ;;  %v2462_v15 = vld [vmem:[%s4679_s1 + $0x48] sm:$0xff]  ;;  %v3615_v18 = vrot.slane %v3542_v1, 1  ;;  %v3622_v19 = vrot.slane %v3537_v0, 1 }
   0xc   :  { %239 = vrot.lane.b32.xlu1 %v39_v4, %s3472_s16  ;;  %233 = vrot.lane.b32.xlu0 %v39_v4, %s3473_s17  ;;  %v2461_v16 = vld [vmem:[%s4679_s1 + $0x40] sm:$0xff]  ;;  %v2476_v17 = vld [vmem:[%s4679_s1 + $0x98] sm:$0xff]  ;;  %vm60_vm1 = vcmask 31744   ;;  %vm245_vm2 = vcmask 228352   ;;  %s3474_s13 = smov 112   ;;  %s3475_s14 = smov 16  }
   0xd   :  { %3008 = vmatprep.subr.mxu1 %v63_v11  ;;  %2999 = vmatprep.mubr.msk.f32.mxu0 %vm72_vm0, %v39_v4  ;;  %v2469_v26 = vld [vmem:[%s4679_s1 + $0x70] sm:$0xff]  ;;  %v2468_v29 = vld [vmem:[%s4679_s1 + $0x68] sm:$0xff]  ;;  %v2467_v31 = vld [vmem:[%s4679_s1 + $0x60] sm:$0xff]  ;;  %vm2346_vm3 = vcmask 523264   ;;  %vm2421_vm4 = vcmask 1041408  }
   0xe   :  { %3009 = vmatpush3.msra.mxu1 %v63_v11  ;;  %3013 = vmatprep.subr.mxu0 %v2464_v12  ;;  %v2482_v34 = vld [vmem:[%s4679_s1 + $0xb8] sm:$0xff]  ;;  %v2475_v36 = vld [vmem:[%s4679_s1 + $0x90] sm:$0xff]  ;;  %v2474_v37 = vld [vmem:[%s4679_s1 + $0x88] sm:$0xff] }
   0xf   :  { %3000 = vmatmul.mubr.msk.f32.vlgmr.msra.gmra.mxu0 %vm72_vm0, %v40_v3  ;;  %3024 = vmatprep.subr.mxu1 %v2470_v13  ;;  %v2473_v41 = vld [vmem:[%s4679_s1 + $0x80] sm:$0xff]  ;;  %v2488_v44 = vld [vmem:[%s4679_s1 + $0xd8] sm:$0xff]  ;;  %v2481_v46 = vld [vmem:[%s4679_s1 + $0xb0] sm:$0xff] }
  0x10   :  { %241 = vrot.lane.b32.xlu1 %v40_v3, %s3472_s16  ;;  %235 = vrot.lane.b32.xlu0 %v40_v3, %s3473_s17  ;;  %v2487_v47 = vld [vmem:[%s4679_s1 + $0xd0] sm:$0xff]  ;;  %v2480_v48 = vld [vmem:[%s4679_s1 + $0xa8] sm:$0xff] }
  0x11   :  { %3014 = vmatpush3.msra.mxu0 %v2464_v12  ;;  %v2479_v52 = vld [vmem:[%s4679_s1 + $0xa0] sm:$0xff]  ;;  %v2486_v53 = vld [vmem:[%s4679_s1 + $0xc8] sm:$0xff]  ;;  %v2494_v54 = vld [vmem:[%s4679_s1 + $0xf8] sm:$0xff] }
  0x12   :  { %3015 = vmatprep.subr.mxu0 %v2463_v14  ;;  %v2485_v57 = vld [vmem:[%s4679_s1 + $0xc0] sm:$0xff]  ;;  %v2493_v59 = vld [vmem:[%s4679_s1 + $0xf0] sm:$0xff]  ;;  %v2500_v60 = vld [vmem:[%s4679_s1 + $0x118] sm:$0xff] }
  0x13   :  { %3016 = vmatpush3.msra.mxu0 %v2463_v14  ;;  %v2492_v61 = vld [vmem:[%s4679_s1 + $0xe8] sm:$0xff]  ;;  %v2499_v5 = vld [vmem:[%s4679_s1 + $0x110] sm:$0xff]  ;;  %v2497_v10 = vld [vmem:[%s4679_s1 + $0x100] sm:$0xff] }
  0x14   :  { %342 = vrot.lane.b32.xlu1 %v3542_v1, %s3471_s11  ;;  %336 = vrot.lane.b32.xlu0 %v3542_v1, %s3470_s0  ;;  %v2498_v6 = vld [vmem:[%s4679_s1 + $0x108] sm:$0xff]  ;;  %v2519_v14 = vld [vmem:[%s4681_s3 + $0xf8] sm:$0xff] }
  0x15   :  { %3017 = vmatprep.subr.mxu0 %v2462_v15 }
  0x16   :  { %3018 = vmatpush3.msra.mxu0 %v2462_v15  ;;  %v2518_v15 = vld [vmem:[%s4681_s3 + $0xf0] sm:$0xff] }
  0x17   :  { %3019 = vmatprep.subr.mxu0 %v2461_v16 }
  0x18   :  { %344 = vrot.lane.b32.xlu1 %v3537_v0, %s3471_s11  ;;  %338 = vrot.lane.b32.xlu0 %v3537_v0, %s3470_s0 }
  0x19   :  { %3020 = vmatpush3.msra.mxu0 %v2461_v16  ;;  %v2517_v16 = vld [vmem:[%s4681_s3 + $0xe8] sm:$0xff] }
  0x1a   :  { %3035 = vmatprep.subr.mxu0 %v2476_v17 }
  0x1c   :  { %530 = vrot.lane.b32.xlu1 %v3542_v1, %s3472_s16  ;;  %524 = vrot.lane.b32.xlu0 %v3542_v1, %s3473_s17 }
  0x20   :  { %532 = vrot.lane.b32.xlu1 %v3537_v0, %s3472_s16  ;;  %526 = vrot.lane.b32.xlu0 %v3537_v0, %s3473_s17 }
  0x24   :  { %641 = vrot.lane.b32.xlu1 %v3615_v18, %s3471_s11  ;;  %635 = vrot.lane.b32.xlu0 %v3615_v18, %s3470_s0 }
  0x28   :  { %643 = vrot.lane.b32.xlu1 %v3622_v19, %s3471_s11  ;;  %637 = vrot.lane.b32.xlu0 %v3622_v19, %s3470_s0 }
  0x2c   :  { %829 = vrot.lane.b32.xlu1 %v3615_v18, %s3472_s16  ;;  %823 = vrot.lane.b32.xlu0 %v3615_v18, %s3473_s17 }
  0x30   :  { %831 = vrot.lane.b32.xlu1 %v3622_v19, %s3472_s16  ;;  %825 = vrot.lane.b32.xlu0 %v3622_v19, %s3473_s17 }
  0x76   :  { %v51_v20 = vpop.permute.xlu1 %50  ;;  %v49_v21 = vpop.permute.xlu0 %48 }
  0x7a   :  { %v57_v22 = vpop.permute.xlu1 %56  ;;  %v55_v23 = vpop.permute.xlu0 %54 }
  0x7b   :  { %v62_v24 = vsel %vm60_vm1, %v51_v20, %v57_v22  ;;  %v61_v25 = vsel %vm60_vm1, %v49_v21, %v55_v23  ;;  %v2513_v20 = vld [vmem:[%s4681_s3 + $0xc8] sm:$0xff]  ;;  %v2512_v21 = vld [vmem:[%s4681_s3 + $0xc0] sm:$0xff]  ;;  %v2511_v22 = vld [vmem:[%s4681_s3 + $0xb8] sm:$0xff] }
  0x7c   :  { %3010 = vmatprep.mubr.msk.f32.mxu1 %vm72_vm0, %v61_v25  ;;  %v2510_v23 = vld [vmem:[%s4681_s3 + $0xb0] sm:$0xff]  ;;  %v2508_v25 = vld [vmem:[%s4681_s3 + $0xa0] sm:$0xff] }
  0x7d   :  { %3011 = vmatmul.mubr.msk.f32.vlgmr.msra.gmra.mxu1 %vm72_vm0, %v62_v24  ;;  %v2509_v24 = vld [vmem:[%s4681_s3 + $0xa8] sm:$0xff] }
  0x7e   :  { %v240_v27 = vpop.permute.xlu1 %239  ;;  %v234_v28 = vpop.permute.xlu0 %233  ;;  %3025 = vmatpush3.msra.mxu1 %v2470_v13 }
  0x7f   :  { %v246_v30 = vsel %vm245_vm2, %v234_v28, %v240_v27  ;;  %3026 = vmatprep.subr.mxu1 %v2469_v26  ;;  %v2506_v27 = vld [vmem:[%s4681_s3 + $0x90] sm:$0xff]  ;;  %v2505_v28 = vld [vmem:[%s4681_s3 + $0x88] sm:$0xff] }
  0x80   :  { %3021 = vmatprep.mubr.msk.f32.mxu0 %vm72_vm0, %v246_v30  ;;  %3027 = vmatpush3.msra.mxu1 %v2469_v26  ;;  %v2507_v26 = vld [vmem:[%s4681_s3 + $0x98] sm:$0xff] }
  0x81   :  { %3028 = vmatprep.subr.mxu1 %v2468_v29  ;;  %v967_v30 = vld [vmem:[%s4681_s3 + $0x78] sm:$0xff] }
  0x82   :  { %v242_v32 = vpop.permute.xlu1 %241  ;;  %v236_v33 = vpop.permute.xlu0 %235  ;;  %3029 = vmatpush3.msra.mxu1 %v2468_v29  ;;  %v2504_v29 = vld [vmem:[%s4681_s3 + $0x80] sm:$0xff] }
  0x83   :  { %v247_v35 = vsel %vm245_vm2, %v236_v33, %v242_v32  ;;  %3030 = vmatprep.subr.mxu1 %v2467_v31  ;;  %v966_v32 = vld [vmem:[%s4681_s3 + $0x70] sm:$0xff]  ;;  %v965_v33 = vld [vmem:[%s4681_s3 + $0x68] sm:$0xff] }
  0x84   :  { %3022 = vmatmul.mubr.msk.f32.vlgmr.msra.gmra.mxu0 %vm72_vm0, %v247_v35  ;;  %3031 = vmatpush3.msra.mxu1 %v2467_v31  ;;  %v3788_v31 = vld [vmem:[%s4681_s3 + $0x178] sm:$0xff] }
  0x85   :  { %3036 = vmatpush3.msra.mxu0 %v2476_v17  ;;  %3046 = vmatprep.subr.mxu1 %v2482_v34  ;;  %v2516_v17 = vld [vmem:[%s4681_s3 + $0xe0] sm:$0xff]  ;;  %v963_v35 = vld [vmem:[%s4681_s3 + $0x58] sm:$0xff] }
  0x86   :  { %v343_v38 = vpop.permute.xlu1 %342  ;;  %v337_v39 = vpop.permute.xlu0 %336  ;;  %3037 = vmatprep.subr.mxu0 %v2475_v36  ;;  %3043 = vmatprep.mubr.msk.f32.mxu0 %vm72_vm0, %v3542_v1  ;;  %v2491_v1 = vld [vmem:[%s4679_s1 + $0xe0] sm:$0xff] }
  0x87   :  { %v348_v40 = vsel %vm60_vm1, %v337_v39, %v343_v38  ;;  %3038 = vmatpush3.msra.mxu0 %v2475_v36  ;;  %v962_v36 = vld [vmem:[%s4681_s3 + $0x50] sm:$0xff]  ;;  %v960_v38 = vld [vmem:[%s4681_s3 + $0x40] sm:$0xff]  ;;  %v959_v39 = vld [vmem:[%s4681_s3 + $0x38] sm:$0xff] }
  0x88   :  { %3032 = vmatprep.mubr.msk.f32.mxu1 %vm72_vm0, %v348_v40  ;;  %3039 = vmatprep.subr.mxu0 %v2474_v37  ;;  %v958_v40 = vld [vmem:[%s4681_s3 + $0x30] sm:$0xff] }
  0x89   :  { %3040 = vmatpush3.msra.mxu0 %v2474_v37  ;;  %v961_v37 = vld [vmem:[%s4681_s3 + $0x48] sm:$0xff] }
  0x8a   :  { %v345_v42 = vpop.permute.xlu1 %344  ;;  %v339_v43 = vpop.permute.xlu0 %338  ;;  %3041 = vmatprep.subr.mxu0 %v2473_v41 }
  0x8b   :  { %v349_v45 = vsel %vm60_vm1, %v339_v43, %v345_v42  ;;  %3042 = vmatpush3.msra.mxu0 %v2473_v41  ;;  %v957_v41 = vld [vmem:[%s4681_s3 + $0x28] sm:$0xff]  ;;  %v956_v42 = vld [vmem:[%s4681_s3 + $0x20] sm:$0xff]  ;;  %v955_v43 = vld [vmem:[%s4681_s3 + $0x18] sm:$0xff] }
  0x8c   :  { %3033 = vmatmul.mubr.msk.f32.vlgmr.msra.gmra.mxu1 %vm72_vm0, %v349_v45  ;;  %3044 = vmatmul.mubr.msk.f32.vlgmr.msra.gmra.mxu0 %vm72_vm0, %v3537_v0  ;;  %v953_v45 = vld [vmem:[%s4681_s3 + $0x8] sm:$0xff] }
  0x8d   :  { %3047 = vmatpush3.msra.mxu1 %v2482_v34  ;;  %3057 = vmatprep.subr.mxu0 %v2488_v44  ;;  %v964_v34 = vld [vmem:[%s4681_s3 + $0x60] sm:$0xff] }
  0x8e   :  { %v531_v49 = vpop.permute.xlu1 %530  ;;  %3048 = vmatprep.subr.mxu1 %v2481_v46  ;;  %v525_v50 = vpop.permute.xlu0 %524  ;;  %3058 = vmatpush3.msra.mxu0 %v2488_v44  ;;  %v954_v44 = vld [vmem:[%s4681_s3 + $0x10] sm:$0xff] }
  0x8f   :  { %v536_v51 = vsel %vm245_vm2, %v525_v50, %v531_v49  ;;  %3049 = vmatpush3.msra.mxu1 %v2481_v46  ;;  %3059 = vmatprep.subr.mxu0 %v2487_v47 }
  0x90   :  { %3050 = vmatprep.subr.mxu1 %v2480_v48  ;;  %3054 = vmatprep.mubr.msk.f32.mxu1 %vm72_vm0, %v536_v51 }
  0x91   :  { %3051 = vmatpush3.msra.mxu1 %v2480_v48  ;;  %3060 = vmatpush3.msra.mxu0 %v2487_v47 }
  0x92   :  { %v533_v55 = vpop.permute.xlu1 %532  ;;  %3052 = vmatprep.subr.mxu1 %v2479_v52  ;;  %v527_v56 = vpop.permute.xlu0 %526  ;;  %3061 = vmatprep.subr.mxu0 %v2486_v53 }
  0x93   :  { %v537_v58 = vsel %vm245_vm2, %v527_v56, %v533_v55  ;;  %3053 = vmatpush3.msra.mxu1 %v2479_v52  ;;  %3062 = vmatpush3.msra.mxu0 %v2486_v53 }
  0x94   :  { %3055 = vmatmul.mubr.msk.f32.vlgmr.msra.gmra.mxu1 %vm72_vm0, %v537_v58  ;;  %3068 = vmatprep.subr.mxu1 %v2494_v54 }
  0x95   :  { %3069 = vmatpush3.msra.mxu1 %v2494_v54  ;;  %3063 = vmatprep.subr.mxu0 %v2485_v57 }
  0x96   :  { %v642_v62 = vpop.permute.xlu1 %641  ;;  %v636_v63 = vpop.permute.xlu0 %635  ;;  %3070 = vmatprep.subr.mxu1 %v2493_v59  ;;  %3064 = vmatpush3.msra.mxu0 %v2485_v57 }
  0x97   :  { %v647_v0 = vsel %vm60_vm1, %v636_v63, %v642_v62  ;;  %3071 = vmatpush3.msra.mxu1 %v2493_v59  ;;  %3079 = vmatprep.subr.mxu0 %v2500_v60 }
  0x98   :  { %3065 = vmatprep.mubr.msk.f32.mxu0 %vm72_vm0, %v647_v0  ;;  %3072 = vmatprep.subr.mxu1 %v2492_v61 }
  0x99   :  { %3073 = vmatpush3.msra.mxu1 %v2492_v61  ;;  %3076 = vmatprep.mubr.msk.f32.mxu1 %vm72_vm0, %v3615_v18  ;;  %v2515_v18 = vld [vmem:[%s4681_s3 + $0xd8] sm:$0xff] }
  0x9a   :  { %v644_v2 = vpop.permute.xlu1 %643  ;;  %v638_v3 = vpop.permute.xlu0 %637  ;;  %3074 = vmatprep.subr.mxu1 %v2491_v1 }
  0x9b   :  { %v648_v4 = vsel %vm60_vm1, %v638_v3, %v644_v2  ;;  %3075 = vmatpush3.msra.mxu1 %v2491_v1 }
  0x9c   :  { %3066 = vmatmul.mubr.msk.f32.vlgmr.msra.gmra.mxu0 %vm72_vm0, %v648_v4  ;;  %3077 = vmatmul.mubr.msk.f32.vlgmr.msra.gmra.mxu1 %vm72_vm0, %v3622_v19  ;;  %v2514_v19 = vld [vmem:[%s4681_s3 + $0xd0] sm:$0xff] }
  0x9d   :  { %3080 = vmatpush3.msra.mxu0 %v2500_v60  ;;  %3090 = vmatprep.subr.mxu1 %v2519_v14 }
  0x9e   :  { %v830_v7 = vpop.permute.xlu1 %829  ;;  %v824_v8 = vpop.permute.xlu0 %823  ;;  %3081 = vmatprep.subr.mxu0 %v2499_v5  ;;  %3091 = vmatpush3.msra.mxu1 %v2519_v14 }
  0x9f   :  { %v835_v9 = vsel %vm245_vm2, %v824_v8, %v830_v7  ;;  %3082 = vmatpush3.msra.mxu0 %v2499_v5  ;;  %3092 = vmatprep.subr.mxu1 %v2518_v15 }
  0xa0   :  { %3083 = vmatprep.subr.mxu0 %v2498_v6  ;;  %3087 = vmatprep.mubr.msk.f32.mxu0 %vm72_vm0, %v835_v9 }
  0xa1   :  { %3084 = vmatpush3.msra.mxu0 %v2498_v6  ;;  %3093 = vmatpush3.msra.mxu1 %v2518_v15 }
  0xa2   :  { %v832_v11 = vpop.permute.xlu1 %831  ;;  %v826_v12 = vpop.permute.xlu0 %825  ;;  %3085 = vmatprep.subr.mxu0 %v2497_v10  ;;  %3094 = vmatprep.subr.mxu1 %v2517_v16 }
  0xa3   :  { %v836_v13 = vsel %vm245_vm2, %v826_v12, %v832_v11  ;;  %3086 = vmatpush3.msra.mxu0 %v2497_v10  ;;  %3095 = vmatpush3.msra.mxu1 %v2517_v16  ;;  %v952_v11 = vld [vmem:[%s4681_s3] sm:$0xff]  ;;  %v3842_v16 = vld [vmem:[%s4681_s3 + $0x1f8] sm:$0xff] }
  0xa4   :  { %3088 = vmatmul.mubr.msk.f32.vlgmr.msra.gmra.mxu0 %vm72_vm0, %v836_v13  ;;  %3096 = vmatprep.subr.mxu1 %v2516_v17  ;;  %v2503_v13 = vld [vmem:[%s4680_s2] ss:$0 sm:$0xff] }
  0xa5   :  { %3097 = vmatpush3.msra.mxu1 %v2516_v17  ;;  %3125 = vmatprep.subr.mxu0 %v967_v30 }
  0xa6   :  { %3098 = vmatprep.subr.mxu1 %v2515_v18  ;;  %3126 = vmatpush3.msra.mxu0 %v967_v30 }
  0xa7   :  { %3099 = vmatpush3.msra.mxu1 %v2515_v18  ;;  %3127 = vmatprep.subr.mxu0 %v966_v32 }
  0xa8   :  { %3100 = vmatprep.subr.mxu1 %v2514_v19  ;;  %3128 = vmatpush3.msra.mxu0 %v966_v32  ;;  %v2532_v32 = vld [vmem:[%s4681_s3 + $0x160] sm:$0xff] }
  0xa9   :  { %3101 = vmatpush3.msra.mxu1 %v2514_v19  ;;  %3129 = vmatprep.subr.mxu0 %v965_v33 }
  0xaa   :  { %3102 = vmatprep.subr.mxu1 %v2513_v20  ;;  %3130 = vmatpush3.msra.mxu0 %v965_v33  ;;  %v2531_v33 = vld [vmem:[%s4681_s3 + $0x158] sm:$0xff] }
  0xab   :  { %3103 = vmatpush3.msra.mxu1 %v2513_v20  ;;  %3131 = vmatprep.subr.mxu0 %v964_v34 }
  0xac   :  { %3104 = vmatprep.subr.mxu1 %v2512_v21  ;;  %3132 = vmatpush3.msra.mxu0 %v964_v34  ;;  %v2530_v34 = vld [vmem:[%s4681_s3 + $0x150] sm:$0xff] }
  0xad   :  { %3105 = vmatpush3.msra.mxu1 %v2512_v21  ;;  %3133 = vmatprep.subr.mxu0 %v963_v35 }
  0xae   :  { %3106 = vmatprep.subr.mxu1 %v2511_v22  ;;  %3134 = vmatpush3.msra.mxu0 %v963_v35  ;;  %v2529_v35 = vld [vmem:[%s4681_s3 + $0x148] sm:$0xff] }
  0xaf   :  { %3107 = vmatpush3.msra.mxu1 %v2511_v22  ;;  %3135 = vmatprep.subr.mxu0 %v962_v36 }
  0xb0   :  { %3108 = vmatprep.subr.mxu1 %v2510_v23  ;;  %3136 = vmatpush3.msra.mxu0 %v962_v36  ;;  %v2528_v36 = vld [vmem:[%s4681_s3 + $0x140] sm:$0xff] }
  0xb1   :  { %3109 = vmatpush3.msra.mxu1 %v2510_v23  ;;  %3137 = vmatprep.subr.mxu0 %v961_v37 }
  0xb2   :  { %3110 = vmatprep.subr.mxu1 %v2509_v24  ;;  %3138 = vmatpush3.msra.mxu0 %v961_v37  ;;  %v2527_v37 = vld [vmem:[%s4681_s3 + $0x138] sm:$0xff] }
  0xb3   :  { %3111 = vmatpush3.msra.mxu1 %v2509_v24  ;;  %3139 = vmatprep.subr.mxu0 %v960_v38 }
  0xb4   :  { %3112 = vmatprep.subr.mxu1 %v2508_v25  ;;  %3140 = vmatpush3.msra.mxu0 %v960_v38  ;;  %v2526_v38 = vld [vmem:[%s4681_s3 + $0x130] sm:$0xff] }
  0xb5   :  { %3113 = vmatpush3.msra.mxu1 %v2508_v25  ;;  %3141 = vmatprep.subr.mxu0 %v959_v39 }
  0xb6   :  { %3114 = vmatprep.subr.mxu1 %v2507_v26  ;;  %3142 = vmatpush3.msra.mxu0 %v959_v39  ;;  %v2525_v39 = vld [vmem:[%s4681_s3 + $0x128] sm:$0xff] }
  0xb7   :  { %3115 = vmatpush3.msra.mxu1 %v2507_v26  ;;  %3143 = vmatprep.subr.mxu0 %v958_v40  ;;  %v2534_v26 = vld [vmem:[%s4681_s3 + $0x170] sm:$0xff] }
  0xb8   :  { %3116 = vmatprep.subr.mxu1 %v2506_v27  ;;  %3144 = vmatpush3.msra.mxu0 %v958_v40  ;;  %v2524_v40 = vld [vmem:[%s4681_s3 + $0x120] sm:$0xff] }
  0xb9   :  { %3117 = vmatpush3.msra.mxu1 %v2506_v27  ;;  %3145 = vmatprep.subr.mxu0 %v957_v41 }
  0xba   :  { %3118 = vmatprep.subr.mxu1 %v2505_v28  ;;  %3146 = vmatpush3.msra.mxu0 %v957_v41  ;;  %v2523_v41 = vld [vmem:[%s4681_s3 + $0x118] sm:$0xff] }
  0xbb   :  { %3119 = vmatpush3.msra.mxu1 %v2505_v28  ;;  %3147 = vmatprep.subr.mxu0 %v956_v42 }
  0xbc   :  { %3120 = vmatprep.subr.mxu1 %v2504_v29  ;;  %3148 = vmatpush3.msra.mxu0 %v956_v42  ;;  %v2522_v42 = vld [vmem:[%s4681_s3 + $0x110] sm:$0xff] }
  0xbd   :  { %3121 = vmatpush3.msra.mxu1 %v2504_v29  ;;  %3149 = vmatprep.subr.mxu0 %v955_v43  ;;  %v2533_v29 = vld [vmem:[%s4681_s3 + $0x168] sm:$0xff] }
  0xbe   :  { %3160 = vmatprep.subr.mxu1 %v3788_v31  ;;  %3150 = vmatpush3.msra.mxu0 %v955_v43  ;;  %v2521_v43 = vld [vmem:[%s4681_s3 + $0x108] sm:$0xff] }
  0xbf   :  { %3151 = vmatprep.subr.mxu0 %v954_v44 }
  0xc0   :  { %3152 = vmatpush3.msra.mxu0 %v954_v44  ;;  %v2520_v44 = vld [vmem:[%s4681_s3 + $0x100] sm:$0xff] }
  0xc1   :  { %3153 = vmatprep.subr.mxu0 %v953_v45 }
  0xc2   :  { %3154 = vmatpush3.msra.mxu0 %v953_v45  ;;  %v2567_v45 = vld [vmem:[%s4681_s3 + $0x278] sm:$0xff] }
  0xc3   :  { %3155 = vmatprep.subr.mxu0 %v952_v11 }
  0xc4   :  { %3156 = vmatpush3.msra.mxu0 %v952_v11  ;;  %v2556_v11 = vld [vmem:[%s4681_s3 + $0x220] sm:$0xff] }
  0xc5   :  { %3195 = vmatprep.subr.mxu0 %v3842_v16 }
  0xcf   :  { %v3001_v46 = vpop.f32.mrf.mxu0 }
  0xd1   :  { %v143_v48 = vpop.f32.mrf.mxu0 }
 0x13d   :  { %v3012_v47 = vpop.f32.mrf.mxu1 }
 0x13e   :  { %v230_v52 = vadd.f32 %v3012_v47, %v3001_v46 }
 0x13f   :  { %v224_v49 = vpop.f32.mrf.mxu1 }
 0x140   :  { %v225_v54 = vadd.f32 %v224_v49, %v143_v48 }
 0x144   :  { %v3023_v50 = vpop.f32.mrf.mxu0 }
 0x145   :  { %v335_v55 = vadd.f32 %v3023_v50, %v230_v52  ;;  %v2550_v52 = vld [vmem:[%s4681_s3 + $0x1f0] sm:$0xff] }
 0x146   :  { %v325_v53 = vpop.f32.mrf.mxu0 }
 0x147   :  { %v334_v58 = vadd.f32 %v325_v53, %v225_v54  ;;  %v2566_v53 = vld [vmem:[%s4681_s3 + $0x270] sm:$0xff] }
 0x14c   :  { %v3034_v51 = vpop.f32.mrf.mxu1  ;;  %v3045_v57 = vpop.f32.mrf.mxu0 }
 0x14d   :  { %v437_v59 = vadd.f32 %v3034_v51, %v335_v55 }
 0x14e   :  { %v427_v56 = vpop.f32.mrf.mxu1  ;;  %v513_v62 = vpop.f32.mrf.mxu0 }
 0x14f   :  { %v436_v61 = vadd.f32 %v427_v56, %v334_v58  ;;  %v523_v63 = vadd.f32 %v3045_v57, %v437_v59  ;;  %v2549_v56 = vld [vmem:[%s4681_s3 + $0x1e8] sm:$0xff]  ;;  %v2548_v58 = vld [vmem:[%s4681_s3 + $0x1e0] sm:$0xff] }
 0x150   :  { %v2565_v57 = vld [vmem:[%s4681_s3 + $0x268] sm:$0xff]  ;;  %v2564_v59 = vld [vmem:[%s4681_s3 + $0x260] sm:$0xff] }
 0x151   :  { %v522_v2 = vadd.f32 %v513_v62, %v436_v61  ;;  %v2563_v61 = vld [vmem:[%s4681_s3 + $0x258] sm:$0xff]  ;;  %v2546_v62 = vld [vmem:[%s4681_s3 + $0x1d0] sm:$0xff] }
 0x154   :  { %v3056_v60 = vpop.f32.mrf.mxu1 }
 0x155   :  { %v625_v3 = vadd.f32 %v3056_v60, %v523_v63  ;;  %v2547_v60 = vld [vmem:[%s4681_s3 + $0x1d8] sm:$0xff]  ;;  %v2562_v63 = vld [vmem:[%s4681_s3 + $0x250] sm:$0xff] }
 0x156   :  { %v615_v0 = vpop.f32.mrf.mxu1 }
 0x157   :  { %v624_v6 = vadd.f32 %v615_v0, %v522_v2  ;;  %v2545_v0 = vld [vmem:[%s4681_s3 + $0x1c8] sm:$0xff]  ;;  %v2544_v2 = vld [vmem:[%s4681_s3 + $0x1c0] sm:$0xff] }
 0x15c   :  { %v3067_v1 = vpop.f32.mrf.mxu0  ;;  %v3078_v5 = vpop.f32.mrf.mxu1 }
 0x15d   :  { %v736_v7 = vadd.f32 %v3067_v1, %v625_v3  ;;  %v2561_v1 = vld [vmem:[%s4681_s3 + $0x248] sm:$0xff]  ;;  %v2560_v3 = vld [vmem:[%s4681_s3 + $0x240] sm:$0xff] }
 0x15e   :  { %v726_v4 = vpop.f32.mrf.mxu0  ;;  %v812_v9 = vpop.f32.mrf.mxu1 }
 0x15f   :  { %v735_v8 = vadd.f32 %v726_v4, %v624_v6  ;;  %v822_v10 = vadd.f32 %v3078_v5, %v736_v7  ;;  %v2543_v4 = vld [vmem:[%s4681_s3 + $0x1b8] sm:$0xff]  ;;  %v2542_v6 = vld [vmem:[%s4681_s3 + $0x1b0] sm:$0xff] }
 0x160   :  { %v2559_v5 = vld [vmem:[%s4681_s3 + $0x238] sm:$0xff]  ;;  %v2558_v7 = vld [vmem:[%s4681_s3 + $0x230] sm:$0xff] }
 0x161   :  { %v821_v14 = vadd.f32 %v812_v9, %v735_v8  ;;  %v2541_v8 = vld [vmem:[%s4681_s3 + $0x1a8] sm:$0xff] }
 0x162   :  { %v2557_v9 = vld [vmem:[%s4681_s3 + $0x228] sm:$0xff] }
 0x164   :  { %v3089_v12 = vpop.f32.mrf.mxu0 }
 0x165   :  { %v924_v15 = vadd.f32 %v3089_v12, %v822_v10  ;;  %v2540_v10 = vld [vmem:[%s4681_s3 + $0x1a0] sm:$0xff]  ;;  %v2539_v12 = vld [vmem:[%s4681_s3 + $0x198] sm:$0xff] }
 0x166   :  { %v914_v17 = vpop.f32.mrf.mxu0 }
 0x167   :  { %v933_v18 = vadd.f32 %v2503_v13, %v924_v15  ;;  %v923_v19 = vadd.f32 %v914_v17, %v821_v14  ;;  %v2538_v14 = vld [vmem:[%s4681_s3 + $0x190] sm:$0xff]  ;;  %v2553_v17 = vld [vmem:[%s4681_s3 + $0x208] sm:$0xff] }
 0x168   :  { %v2554_v15 = vld [vmem:[%s4681_s3 + $0x210] sm:$0xff] }
 0x169   :  { %v3845_v20 = vmax.f32 %v933_v18, 0.0  ;;  %v932_v21 = vadd.f32 %v2503_v13, %v923_v19  ;;  %v2555_v13 = vld [vmem:[%s4681_s3 + $0x218] sm:$0xff]  ;;  %v2536_v18 = vld [vmem:[%s4681_s3 + $0x180] sm:$0xff] }
 0x16a   :  { %v2552_v19 = vld [vmem:[%s4681_s3 + $0x200] sm:$0xff] }
 0x16b   :  { %v3847_v22 = vmax.f32 %v932_v21, 0.0  ;;  %v939_v24 = vrot.slane %v3845_v20, 7  ;;  %v1530_v30 = vrot.slane %v3845_v20, 1 }
 0x16d   :  { %v938_v23 = vrot.slane %v3847_v22, 7  ;;  %v3429_v27 = vpack.i.bf16 %v3845_v20, %v3847_v22  ;;  %v1529_v28 = vrot.slane %v3847_v22, 1 }
 0x16f   :  { %3122 = vmatprep.mubr.f32.mxu1 %v938_v23  ;;  %v3419_v25 = vpack.i.bf16 %v939_v24, %v938_v23 }
 0x170   :  { %3123 = vmatmul.mubr.f32.vlgmr.msra.gmra.mxu1 %v939_v24 }
 0x171   :  { %3420 = vrot.lane.b32.xlu1 %v3419_v25, %s3474_s13  ;;  %3415 = vrot.lane.b32.xlu0 %v3419_v25, %s3475_s14  ;;  %v2583_v25 = vld [vmem:[%s4681_s3 + $0x2f8] sm:$0xff] }
 0x172   :  { %3161 = vmatpush3.msra.mxu1 %v3788_v31  ;;  %v3439_v31 = vpack.i.bf16 %v1530_v30, %v1529_v28 }
 0x173   :  { %3162 = vmatprep.subr.mxu1 %v2534_v26 }
 0x174   :  { %3163 = vmatpush3.msra.mxu1 %v2534_v26  ;;  %v2599_v26 = vld [vmem:[%s4681_s3 + $0x378] sm:$0xff] }
 0x175   :  { %3430 = vrot.lane.b32.xlu1 %v3429_v27, %s3474_s13  ;;  %3425 = vrot.lane.b32.xlu0 %v3429_v27, %s3475_s14 }
 0x176   :  { %3164 = vmatprep.subr.mxu1 %v2533_v29 }
 0x177   :  { %3165 = vmatpush3.msra.mxu1 %v2533_v29 }
 0x178   :  { %3166 = vmatprep.subr.mxu1 %v2532_v32 }
 0x179   :  { %3440 = vrot.lane.b32.xlu1 %v3439_v31, %s3474_s13  ;;  %3435 = vrot.lane.b32.xlu0 %v3439_v31, %s3475_s14  ;;  %v2598_v31 = vld [vmem:[%s4681_s3 + $0x370] sm:$0xff] }
 0x17a   :  { %3167 = vmatpush3.msra.mxu1 %v2532_v32  ;;  %v2582_v32 = vld [vmem:[%s4681_s3 + $0x2f0] sm:$0xff] }
 0x17b   :  { %3168 = vmatprep.subr.mxu1 %v2531_v33 }
 0x17c   :  { %3169 = vmatpush3.msra.mxu1 %v2531_v33  ;;  %v2581_v33 = vld [vmem:[%s4681_s3 + $0x2e8] sm:$0xff] }
 0x17d   :  { %3170 = vmatprep.subr.mxu1 %v2530_v34 }
 0x17e   :  { %3171 = vmatpush3.msra.mxu1 %v2530_v34  ;;  %v2597_v34 = vld [vmem:[%s4681_s3 + $0x368] sm:$0xff] }
 0x17f   :  { %3172 = vmatprep.subr.mxu1 %v2529_v35 }
 0x180   :  { %3173 = vmatpush3.msra.mxu1 %v2529_v35  ;;  %v2580_v35 = vld [vmem:[%s4681_s3 + $0x2e0] sm:$0xff] }
 0x181   :  { %3174 = vmatprep.subr.mxu1 %v2528_v36 }
 0x182   :  { %3175 = vmatpush3.msra.mxu1 %v2528_v36  ;;  %v2596_v36 = vld [vmem:[%s4681_s3 + $0x360] sm:$0xff] }
 0x183   :  { %3176 = vmatprep.subr.mxu1 %v2527_v37 }
 0x184   :  { %3177 = vmatpush3.msra.mxu1 %v2527_v37  ;;  %v2579_v37 = vld [vmem:[%s4681_s3 + $0x2d8] sm:$0xff] }
 0x185   :  { %3178 = vmatprep.subr.mxu1 %v2526_v38 }
 0x186   :  { %3179 = vmatpush3.msra.mxu1 %v2526_v38  ;;  %v2595_v38 = vld [vmem:[%s4681_s3 + $0x358] sm:$0xff] }
 0x187   :  { %3180 = vmatprep.subr.mxu1 %v2525_v39 }
 0x188   :  { %3181 = vmatpush3.msra.mxu1 %v2525_v39  ;;  %v2578_v39 = vld [vmem:[%s4681_s3 + $0x2d0] sm:$0xff] }
 0x189   :  { %3182 = vmatprep.subr.mxu1 %v2524_v40 }
 0x18a   :  { %3183 = vmatpush3.msra.mxu1 %v2524_v40  ;;  %v2594_v40 = vld [vmem:[%s4681_s3 + $0x350] sm:$0xff] }
 0x18b   :  { %3184 = vmatprep.subr.mxu1 %v2523_v41 }
 0x18c   :  { %3185 = vmatpush3.msra.mxu1 %v2523_v41  ;;  %v2577_v41 = vld [vmem:[%s4681_s3 + $0x2c8] sm:$0xff] }
 0x18d   :  { %3186 = vmatprep.subr.mxu1 %v2522_v42 }
 0x18e   :  { %3187 = vmatpush3.msra.mxu1 %v2522_v42  ;;  %v2593_v42 = vld [vmem:[%s4681_s3 + $0x348] sm:$0xff] }
 0x18f   :  { %3188 = vmatprep.subr.mxu1 %v2521_v43 }
 0x190   :  { %3189 = vmatpush3.msra.mxu1 %v2521_v43  ;;  %v2576_v43 = vld [vmem:[%s4681_s3 + $0x2c0] sm:$0xff] }
 0x191   :  { %3190 = vmatprep.subr.mxu1 %v2520_v44 }
 0x192   :  { %3191 = vmatpush3.msra.mxu1 %v2520_v44  ;;  %v2592_v44 = vld [vmem:[%s4681_s3 + $0x340] sm:$0xff] }
 0x193   :  { %3230 = vmatprep.subr.mxu1 %v2567_v45 }
 0x1e3   :  { %v3421_v46 = vpop.permute.xlu1 %3420  ;;  %v3416_v47 = vpop.permute.xlu0 %3415 }
 0x1e4   :  { %v3423_v48 = vunpack.i.h.bf16 %v3421_v46  ;;  %v3422_v49 = vunpack.i.l.bf16 %v3421_v46  ;;  %v3418_v50 = vunpack.i.h.bf16 %v3416_v47  ;;  %v3417_v51 = vunpack.i.l.bf16 %v3416_v47  ;;  %v2591_v46 = vld [vmem:[%s4681_s3 + $0x338] sm:$0xff]  ;;  %v2574_v47 = vld [vmem:[%s4681_s3 + $0x2b0] sm:$0xff] }
 0x1e6   :  { %3157 = vmatprep.mubr.f32.mxu0 %v3417_v51  ;;  %3192 = vmatprep.mubr.f32.mxu1 %v3422_v49  ;;  %v2573_v49 = vld [vmem:[%s4681_s3 + $0x2a8] sm:$0xff]  ;;  %v2572_v51 = vld [vmem:[%s4681_s3 + $0x2a0] sm:$0xff] }
 0x1e7   :  { %v3914_v54 = vpop.permute.xlu0 %3425  ;;  %3158 = vmatmul.mubr.f32.vlgmr.msra.gmra.mxu0 %v3418_v50  ;;  %3193 = vmatmul.mubr.f32.vlgmr.msra.gmra.mxu1 %v3423_v48  ;;  %v4003_v21 = vpop.permute.xlu1 %3430  ;;  %v2590_v48 = vld [vmem:[%s4681_s3 + $0x330] sm:$0xff]  ;;  %v2589_v50 = vld [vmem:[%s4681_s3 + $0x328] sm:$0xff] }
 0x1e8   :  { %v3427_v55 = vunpack.i.l.bf16 %v3914_v54  ;;  %3196 = vmatpush3.msra.mxu0 %v3842_v16  ;;  %3231 = vmatpush3.msra.mxu1 %v2567_v45  ;;  %v2537_v16 = vld [vmem:[%s4681_s3 + $0x188] sm:$0xff]  ;;  %v3428_v23 = vunpack.i.h.bf16 %v3914_v54  ;;  %v3432_v27 = vunpack.i.l.bf16 %v4003_v21  ;;  %v2575_v45 = vld [vmem:[%s4681_s3 + $0x2b8] sm:$0xff] }
 0x1e9   :  { %3197 = vmatprep.subr.mxu0 %v2550_v52  ;;  %3232 = vmatprep.subr.mxu1 %v2566_v53  ;;  %v2587_v54 = vld [vmem:[%s4681_s3 + $0x318] sm:$0xff] }
 0x1ea   :  { %3262 = vmatprep.mubr.f32.mxu1 %v3847_v22  ;;  %3198 = vmatpush3.msra.mxu0 %v2550_v52  ;;  %v2588_v52 = vld [vmem:[%s4681_s3 + $0x320] sm:$0xff] }
 0x1eb   :  { %3233 = vmatpush3.msra.mxu1 %v2566_v53  ;;  %3199 = vmatprep.subr.mxu0 %v2549_v56  ;;  %v4006_v24 = vpop.permute.xlu0 %3435  ;;  %v2571_v53 = vld [vmem:[%s4681_s3 + $0x298] sm:$0xff]  ;;  %v2628_v22 = vld [vmem:[%s4681_s3 + $0x460] sm:$0xff] }
 0x1ec   :  { %3227 = vmatprep.mubr.f32.mxu0 %v3427_v55  ;;  %3234 = vmatprep.subr.mxu1 %v2565_v57  ;;  %v3437_v29 = vunpack.i.l.bf16 %v4006_v24  ;;  %v2570_v55 = vld [vmem:[%s4681_s3 + $0x290] sm:$0xff] }
 0x1ed   :  { %3200 = vmatpush3.msra.mxu0 %v2549_v56  ;;  %3235 = vmatpush3.msra.mxu1 %v2565_v57  ;;  %v2586_v56 = vld [vmem:[%s4681_s3 + $0x310] sm:$0xff]  ;;  %v2569_v57 = vld [vmem:[%s4681_s3 + $0x288] sm:$0xff] }
 0x1ee   :  { %3201 = vmatprep.subr.mxu0 %v2548_v58  ;;  %3236 = vmatprep.subr.mxu1 %v2564_v59 }
 0x1ef   :  { %3202 = vmatpush3.msra.mxu0 %v2548_v58  ;;  %3237 = vmatpush3.msra.mxu1 %v2564_v59  ;;  %v2585_v58 = vld [vmem:[%s4681_s3 + $0x308] sm:$0xff]  ;;  %v2568_v59 = vld [vmem:[%s4681_s3 + $0x280] sm:$0xff] }
 0x1f0   :  { %3203 = vmatprep.subr.mxu0 %v2547_v60  ;;  %3238 = vmatprep.subr.mxu1 %v2563_v61 }
 0x1f1   :  { %3204 = vmatpush3.msra.mxu0 %v2547_v60  ;;  %3239 = vmatpush3.msra.mxu1 %v2563_v61  ;;  %v2584_v60 = vld [vmem:[%s4681_s3 + $0x300] sm:$0xff]  ;;  %v3433_v61 = vunpack.i.h.bf16 %v4003_v21  ;;  %v2621_v21 = vld [vmem:[%s4681_s3 + $0x428] sm:$0xff] }
 0x1f2   :  { %3205 = vmatprep.subr.mxu0 %v2546_v62  ;;  %3240 = vmatprep.subr.mxu1 %v2562_v63 }
 0x1f3   :  { %3206 = vmatpush3.msra.mxu0 %v2546_v62  ;;  %3241 = vmatpush3.msra.mxu1 %v2562_v63  ;;  %v4108_v62 = vpop.permute.xlu1 %3440  ;;  %v3438_v63 = vunpack.i.h.bf16 %v4006_v24  ;;  %v2620_v24 = vld [vmem:[%s4681_s3 + $0x420] sm:$0xff] }
 0x1f4   :  { %3207 = vmatprep.subr.mxu0 %v2545_v0  ;;  %3242 = vmatprep.subr.mxu1 %v2561_v1 }
 0x1f5   :  { %3208 = vmatpush3.msra.mxu0 %v2545_v0  ;;  %3243 = vmatpush3.msra.mxu1 %v2561_v1  ;;  %v2615_v0 = vld [vmem:[%s4681_s3 + $0x3f8] sm:$0xff] }
 0x1f6   :  { %3209 = vmatprep.subr.mxu0 %v2544_v2  ;;  %3244 = vmatprep.subr.mxu1 %v2560_v3  ;;  %v2631_v1 = vld [vmem:[%s4681_s3 + $0x478] sm:$0xff] }
 0x1f7   :  { %3210 = vmatpush3.msra.mxu0 %v2544_v2  ;;  %3245 = vmatpush3.msra.mxu1 %v2560_v3  ;;  %v3442_v2 = vunpack.i.l.bf16 %v4108_v62  ;;  %v2614_v3 = vld [vmem:[%s4681_s3 + $0x3f0] sm:$0xff] }
 0x1f8   :  { %3211 = vmatprep.subr.mxu0 %v2543_v4  ;;  %3246 = vmatprep.subr.mxu1 %v2559_v5 }
 0x1f9   :  { %3212 = vmatpush3.msra.mxu0 %v2543_v4  ;;  %3247 = vmatpush3.msra.mxu1 %v2559_v5  ;;  %v2630_v4 = vld [vmem:[%s4681_s3 + $0x470] sm:$0xff]  ;;  %v2613_v5 = vld [vmem:[%s4681_s3 + $0x3e8] sm:$0xff] }
 0x1fa   :  { %3213 = vmatprep.subr.mxu0 %v2542_v6  ;;  %3248 = vmatprep.subr.mxu1 %v2558_v7 }
 0x1fb   :  { %3214 = vmatpush3.msra.mxu0 %v2542_v6  ;;  %3249 = vmatpush3.msra.mxu1 %v2558_v7  ;;  %v2629_v6 = vld [vmem:[%s4681_s3 + $0x468] sm:$0xff]  ;;  %v2612_v7 = vld [vmem:[%s4681_s3 + $0x3e0] sm:$0xff] }
 0x1fc   :  { %3215 = vmatprep.subr.mxu0 %v2541_v8  ;;  %3250 = vmatprep.subr.mxu1 %v2557_v9 }
 0x1fd   :  { %3216 = vmatpush3.msra.mxu0 %v2541_v8  ;;  %3251 = vmatpush3.msra.mxu1 %v2557_v9  ;;  %v2627_v8 = vld [vmem:[%s4681_s3 + $0x458] sm:$0xff]  ;;  %v2610_v9 = vld [vmem:[%s4681_s3 + $0x3d0] sm:$0xff] }
 0x1fe   :  { %3217 = vmatprep.subr.mxu0 %v2540_v10  ;;  %3252 = vmatprep.subr.mxu1 %v2556_v11 }
 0x1ff   :  { %3218 = vmatpush3.msra.mxu0 %v2540_v10  ;;  %3253 = vmatpush3.msra.mxu1 %v2556_v11  ;;  %v2626_v10 = vld [vmem:[%s4681_s3 + $0x450] sm:$0xff]  ;;  %v2609_v11 = vld [vmem:[%s4681_s3 + $0x3c8] sm:$0xff] }
 0x200   :  { %3219 = vmatprep.subr.mxu0 %v2539_v12  ;;  %3254 = vmatprep.subr.mxu1 %v2555_v13 }
 0x201   :  { %3220 = vmatpush3.msra.mxu0 %v2539_v12  ;;  %3255 = vmatpush3.msra.mxu1 %v2555_v13  ;;  %v2625_v12 = vld [vmem:[%s4681_s3 + $0x448] sm:$0xff]  ;;  %v2608_v13 = vld [vmem:[%s4681_s3 + $0x3c0] sm:$0xff] }
 0x202   :  { %3221 = vmatprep.subr.mxu0 %v2538_v14  ;;  %3256 = vmatprep.subr.mxu1 %v2554_v15 }
 0x203   :  { %3222 = vmatpush3.msra.mxu0 %v2538_v14  ;;  %3257 = vmatpush3.msra.mxu1 %v2554_v15  ;;  %v2624_v14 = vld [vmem:[%s4681_s3 + $0x440] sm:$0xff]  ;;  %v2607_v15 = vld [vmem:[%s4681_s3 + $0x3b8] sm:$0xff] }
 0x204   :  { %3223 = vmatprep.subr.mxu0 %v2537_v16  ;;  %3258 = vmatprep.subr.mxu1 %v2553_v17 }
 0x205   :  { %3224 = vmatpush3.msra.mxu0 %v2537_v16  ;;  %3259 = vmatpush3.msra.mxu1 %v2553_v17  ;;  %v2623_v16 = vld [vmem:[%s4681_s3 + $0x438] sm:$0xff]  ;;  %v2606_v17 = vld [vmem:[%s4681_s3 + $0x3b0] sm:$0xff] }
 0x206   :  { %3225 = vmatprep.subr.mxu0 %v2536_v18  ;;  %3260 = vmatprep.subr.mxu1 %v2552_v19 }
 0x207   :  { %3226 = vmatpush3.msra.mxu0 %v2536_v18  ;;  %3261 = vmatpush3.msra.mxu1 %v2552_v19  ;;  %v2622_v18 = vld [vmem:[%s4681_s3 + $0x430] sm:$0xff]  ;;  %v2605_v19 = vld [vmem:[%s4681_s3 + $0x3a8] sm:$0xff] }
 0x208   :  { %3228 = vmatmul.mubr.f32.vlgmr.msra.gmra.mxu0 %v3428_v23  ;;  %3263 = vmatmul.mubr.f32.vlgmr.msra.gmra.mxu1 %v3845_v20  ;;  %v2604_v23 = vld [vmem:[%s4681_s3 + $0x3a0] sm:$0xff]  ;;  %v1856_v20 = vld [vmem:[%s4683_s5 + $0x70] sm:$0xff] }
 0x209   :  { %3265 = vmatprep.subr.mxu0 %v2583_v25  ;;  %3300 = vmatprep.subr.mxu1 %v2599_v26 }
 0x20a   :  { %3266 = vmatpush3.msra.mxu0 %v2583_v25  ;;  %3297 = vmatprep.mubr.f32.mxu0 %v3432_v27  ;;  %v2603_v25 = vld [vmem:[%s4681_s3 + $0x398] sm:$0xff]  ;;  %v2602_v27 = vld [vmem:[%s4681_s3 + $0x390] sm:$0xff] }
 0x20b   :  { %3301 = vmatpush3.msra.mxu1 %v2599_v26  ;;  %3332 = vmatprep.mubr.f32.mxu1 %v3437_v29  ;;  %v2619_v26 = vld [vmem:[%s4681_s3 + $0x418] sm:$0xff]  ;;  %v2618_v29 = vld [vmem:[%s4681_s3 + $0x410] sm:$0xff] }
 0x20c   :  { %3267 = vmatprep.subr.mxu0 %v2582_v32  ;;  %3302 = vmatprep.subr.mxu1 %v2598_v31 }
 0x20d   :  { %3268 = vmatpush3.msra.mxu0 %v2582_v32  ;;  %3303 = vmatpush3.msra.mxu1 %v2598_v31  ;;  %v2601_v32 = vld [vmem:[%s4681_s3 + $0x388] sm:$0xff] }
 0x20e   :  { %3269 = vmatprep.subr.mxu0 %v2581_v33  ;;  %3304 = vmatprep.subr.mxu1 %v2597_v34  ;;  %v2617_v31 = vld [vmem:[%s4681_s3 + $0x408] sm:$0xff] }
 0x20f   :  { %3270 = vmatpush3.msra.mxu0 %v2581_v33  ;;  %3305 = vmatpush3.msra.mxu1 %v2597_v34  ;;  %v2600_v33 = vld [vmem:[%s4681_s3 + $0x380] sm:$0xff] }
 0x210   :  { %3271 = vmatprep.subr.mxu0 %v2580_v35  ;;  %3306 = vmatprep.subr.mxu1 %v2596_v36  ;;  %v2616_v34 = vld [vmem:[%s4681_s3 + $0x400] sm:$0xff] }
 0x211   :  { %3272 = vmatpush3.msra.mxu0 %v2580_v35  ;;  %3307 = vmatpush3.msra.mxu1 %v2596_v36  ;;  %v3443_v35 = vunpack.i.h.bf16 %v4108_v62  ;;  %v1873_v36 = vld [vmem:[%s4683_s5 + $0xf8] sm:$0xff]  ;;  %v1850_v62 = vld [vmem:[%s4683_s5 + $0x40] sm:$0xff] }
 0x212   :  { %3273 = vmatprep.subr.mxu0 %v2579_v37  ;;  %3308 = vmatprep.subr.mxu1 %v2595_v38 }
 0x213   :  { %3274 = vmatpush3.msra.mxu0 %v2579_v37  ;;  %3309 = vmatpush3.msra.mxu1 %v2595_v38  ;;  %v1857_v37 = vld [vmem:[%s4683_s5 + $0x78] sm:$0xff]  ;;  %v1872_v38 = vld [vmem:[%s4683_s5 + $0xf0] sm:$0xff] }
 0x214   :  { %3275 = vmatprep.subr.mxu0 %v2578_v39  ;;  %3310 = vmatprep.subr.mxu1 %v2594_v40 }
 0x215   :  { %3276 = vmatpush3.msra.mxu0 %v2578_v39  ;;  %3311 = vmatpush3.msra.mxu1 %v2594_v40  ;;  %v1905_v39 = vld [vmem:[%s4683_s5 + $0x1f8] sm:$0xff]  ;;  %v1871_v40 = vld [vmem:[%s4683_s5 + $0xe8] sm:$0xff] }
 0x216   :  { %3277 = vmatprep.subr.mxu0 %v2577_v41  ;;  %3312 = vmatprep.subr.mxu1 %v2593_v42 }
 0x217   :  { %3278 = vmatpush3.msra.mxu0 %v2577_v41  ;;  %3313 = vmatpush3.msra.mxu1 %v2593_v42  ;;  %v1904_v41 = vld [vmem:[%s4683_s5 + $0x1f0] sm:$0xff]  ;;  %v1855_v42 = vld [vmem:[%s4683_s5 + $0x68] sm:$0xff] }
 0x218   :  { %3279 = vmatprep.subr.mxu0 %v2576_v43  ;;  %3314 = vmatprep.subr.mxu1 %v2592_v44 }
 0x219   :  { %3280 = vmatpush3.msra.mxu0 %v2576_v43  ;;  %3315 = vmatpush3.msra.mxu1 %v2592_v44  ;;  %v1888_v43 = vld [vmem:[%s4683_s5 + $0x170] sm:$0xff]  ;;  %v1903_v44 = vld [vmem:[%s4683_s5 + $0x1e8] sm:$0xff] }
 0x21a   :  { %3281 = vmatprep.subr.mxu0 %v2575_v45  ;;  %3316 = vmatprep.subr.mxu1 %v2591_v46 }
 0x21b   :  { %3282 = vmatpush3.msra.mxu0 %v2575_v45  ;;  %3317 = vmatpush3.msra.mxu1 %v2591_v46  ;;  %v1870_v45 = vld [vmem:[%s4683_s5 + $0xe0] sm:$0xff]  ;;  %v1887_v46 = vld [vmem:[%s4683_s5 + $0x168] sm:$0xff] }
 0x21c   :  { %3283 = vmatprep.subr.mxu0 %v2574_v47  ;;  %3318 = vmatprep.subr.mxu1 %v2590_v48 }
 0x21d   :  { %3284 = vmatpush3.msra.mxu0 %v2574_v47  ;;  %3319 = vmatpush3.msra.mxu1 %v2590_v48  ;;  %v1854_v47 = vld [vmem:[%s4683_s5 + $0x60] sm:$0xff] }
 0x21e   :  { %3285 = vmatprep.subr.mxu0 %v2573_v49  ;;  %3320 = vmatprep.subr.mxu1 %v2589_v50  ;;  %v1902_v48 = vld [vmem:[%s4683_s5 + $0x1e0] sm:$0xff] }
 0x21f   :  { %3286 = vmatpush3.msra.mxu0 %v2573_v49  ;;  %3321 = vmatpush3.msra.mxu1 %v2589_v50  ;;  %v1869_v49 = vld [vmem:[%s4683_s5 + $0xd8] sm:$0xff]  ;;  %v1886_v50 = vld [vmem:[%s4683_s5 + $0x160] sm:$0xff] }
 0x220   :  { %3287 = vmatprep.subr.mxu0 %v2572_v51  ;;  %3322 = vmatprep.subr.mxu1 %v2588_v52 }
 0x221   :  { %3288 = vmatpush3.msra.mxu0 %v2572_v51  ;;  %3323 = vmatpush3.msra.mxu1 %v2588_v52  ;;  %v1853_v51 = vld [vmem:[%s4683_s5 + $0x58] sm:$0xff] }
 0x222   :  { %3289 = vmatprep.subr.mxu0 %v2571_v53  ;;  %3324 = vmatprep.subr.mxu1 %v2587_v54  ;;  %v1901_v52 = vld [vmem:[%s4683_s5 + $0x1d8] sm:$0xff] }
 0x223   :  { %3290 = vmatpush3.msra.mxu0 %v2571_v53  ;;  %3325 = vmatpush3.msra.mxu1 %v2587_v54  ;;  %v1868_v53 = vld [vmem:[%s4683_s5 + $0xd0] sm:$0xff]  ;;  %v1885_v54 = vld [vmem:[%s4683_s5 + $0x158] sm:$0xff] }
 0x224   :  { %3291 = vmatprep.subr.mxu0 %v2570_v55  ;;  %3326 = vmatprep.subr.mxu1 %v2586_v56 }
 0x225   :  { %3292 = vmatpush3.msra.mxu0 %v2570_v55  ;;  %3327 = vmatpush3.msra.mxu1 %v2586_v56  ;;  %v1852_v55 = vld [vmem:[%s4683_s5 + $0x50] sm:$0xff] }
 0x226   :  { %3293 = vmatprep.subr.mxu0 %v2569_v57  ;;  %3328 = vmatprep.subr.mxu1 %v2585_v58  ;;  %v1900_v56 = vld [vmem:[%s4683_s5 + $0x1d0] sm:$0xff] }
 0x227   :  { %3294 = vmatpush3.msra.mxu0 %v2569_v57  ;;  %3329 = vmatpush3.msra.mxu1 %v2585_v58  ;;  %v1867_v57 = vld [vmem:[%s4683_s5 + $0xc8] sm:$0xff] }
 0x228   :  { %3295 = vmatprep.subr.mxu0 %v2568_v59  ;;  %3330 = vmatprep.subr.mxu1 %v2584_v60  ;;  %v1851_v58 = vld [vmem:[%s4683_s5 + $0x48] sm:$0xff] }
 0x229   :  { %3296 = vmatpush3.msra.mxu0 %v2568_v59  ;;  %3331 = vmatpush3.msra.mxu1 %v2584_v60  ;;  %v1884_v59 = vld [vmem:[%s4683_s5 + $0x150] sm:$0xff]  ;;  %v1866_v60 = vld [vmem:[%s4683_s5 + $0xc0] sm:$0xff] }
 0x22a   :  { %3298 = vmatmul.mubr.f32.vlgmr.msra.gmra.mxu0 %v3433_v61  ;;  %3333 = vmatmul.mubr.f32.vlgmr.msra.gmra.mxu1 %v3438_v63  ;;  %v1899_v61 = vld [vmem:[%s4683_s5 + $0x1c8] sm:$0xff] }
 0x22b   :  { %3335 = vmatprep.subr.mxu0 %v2615_v0  ;;  %3370 = vmatprep.subr.mxu1 %v2631_v1  ;;  %v1883_v63 = vld [vmem:[%s4683_s5 + $0x148] sm:$0xff] }
 0x22c   :  { %3336 = vmatpush3.msra.mxu0 %v2615_v0  ;;  %3367 = vmatprep.mubr.f32.mxu0 %v1529_v28  ;;  %v2611_v28 = vld [vmem:[%s4681_s3 + $0x3d8] sm:$0xff] }
 0x22d   :  { %3371 = vmatpush3.msra.mxu1 %v2631_v1  ;;  %3402 = vmatprep.mubr.f32.mxu1 %v3442_v2  ;;  %v1865_v0 = vld [vmem:[%s4683_s5 + $0xb8] sm:$0xff]  ;;  %v1898_v1 = vld [vmem:[%s4683_s5 + $0x1c0] sm:$0xff] }
 0x22e   :  { %3337 = vmatprep.subr.mxu0 %v2614_v3  ;;  %3372 = vmatprep.subr.mxu1 %v2630_v4  ;;  %v1849_v2 = vld [vmem:[%s4683_s5 + $0x38] sm:$0xff] }
 0x22f   :  { %3338 = vmatpush3.msra.mxu0 %v2614_v3  ;;  %3373 = vmatpush3.msra.mxu1 %v2630_v4  ;;  %v1882_v3 = vld [vmem:[%s4683_s5 + $0x140] sm:$0xff]  ;;  %v1864_v4 = vld [vmem:[%s4683_s5 + $0xb0] sm:$0xff] }
 0x230   :  { %3339 = vmatprep.subr.mxu0 %v2613_v5  ;;  %3374 = vmatprep.subr.mxu1 %v2629_v6 }
 0x231   :  { %3340 = vmatpush3.msra.mxu0 %v2613_v5  ;;  %3375 = vmatpush3.msra.mxu1 %v2629_v6  ;;  %v1897_v5 = vld [vmem:[%s4683_s5 + $0x1b8] sm:$0xff]  ;;  %v1848_v6 = vld [vmem:[%s4683_s5 + $0x30] sm:$0xff] }
 0x232   :  { %3341 = vmatprep.subr.mxu0 %v2612_v7  ;;  %3376 = vmatprep.subr.mxu1 %v2628_v22 }
 0x233   :  { %3342 = vmatpush3.msra.mxu0 %v2612_v7  ;;  %3377 = vmatpush3.msra.mxu1 %v2628_v22  ;;  %v1881_v7 = vld [vmem:[%s4683_s5 + $0x138] sm:$0xff]  ;;  %v1863_v22 = vld [vmem:[%s4683_s5 + $0xa8] sm:$0xff] }
 0x234   :  { %3343 = vmatprep.subr.mxu0 %v2611_v28  ;;  %3378 = vmatprep.subr.mxu1 %v2627_v8 }
 0x235   :  { %3344 = vmatpush3.msra.mxu0 %v2611_v28  ;;  %3379 = vmatpush3.msra.mxu1 %v2627_v8  ;;  %v1896_v28 = vld [vmem:[%s4683_s5 + $0x1b0] sm:$0xff]  ;;  %v1847_v8 = vld [vmem:[%s4683_s5 + $0x28] sm:$0xff] }
 0x236   :  { %3345 = vmatprep.subr.mxu0 %v2610_v9  ;;  %3380 = vmatprep.subr.mxu1 %v2626_v10 }
 0x237   :  { %3346 = vmatpush3.msra.mxu0 %v2610_v9  ;;  %3381 = vmatpush3.msra.mxu1 %v2626_v10  ;;  %v1880_v9 = vld [vmem:[%s4683_s5 + $0x130] sm:$0xff]  ;;  %v1862_v10 = vld [vmem:[%s4683_s5 + $0xa0] sm:$0xff] }
 0x238   :  { %3347 = vmatprep.subr.mxu0 %v2609_v11  ;;  %3382 = vmatprep.subr.mxu1 %v2625_v12 }
 0x239   :  { %3348 = vmatpush3.msra.mxu0 %v2609_v11  ;;  %3383 = vmatpush3.msra.mxu1 %v2625_v12  ;;  %v1895_v11 = vld [vmem:[%s4683_s5 + $0x1a8] sm:$0xff]  ;;  %v1846_v12 = vld [vmem:[%s4683_s5 + $0x20] sm:$0xff] }
 0x23a   :  { %3349 = vmatprep.subr.mxu0 %v2608_v13  ;;  %3384 = vmatprep.subr.mxu1 %v2624_v14 }
 0x23b   :  { %3350 = vmatpush3.msra.mxu0 %v2608_v13  ;;  %3385 = vmatpush3.msra.mxu1 %v2624_v14  ;;  %v1879_v13 = vld [vmem:[%s4683_s5 + $0x128] sm:$0xff]  ;;  %v1861_v14 = vld [vmem:[%s4683_s5 + $0x98] sm:$0xff] }
 0x23c   :  { %3351 = vmatprep.subr.mxu0 %v2607_v15  ;;  %3386 = vmatprep.subr.mxu1 %v2623_v16 }
 0x23d   :  { %3352 = vmatpush3.msra.mxu0 %v2607_v15  ;;  %3387 = vmatpush3.msra.mxu1 %v2623_v16  ;;  %v1894_v15 = vld [vmem:[%s4683_s5 + $0x1a0] sm:$0xff]  ;;  %v1845_v16 = vld [vmem:[%s4683_s5 + $0x18] sm:$0xff] }
 0x23e   :  { %3353 = vmatprep.subr.mxu0 %v2606_v17  ;;  %3388 = vmatprep.subr.mxu1 %v2622_v18 }
 0x23f   :  { %3354 = vmatpush3.msra.mxu0 %v2606_v17  ;;  %3389 = vmatpush3.msra.mxu1 %v2622_v18  ;;  %v1878_v17 = vld [vmem:[%s4683_s5 + $0x120] sm:$0xff]  ;;  %v1860_v18 = vld [vmem:[%s4683_s5 + $0x90] sm:$0xff] }
 0x240   :  { %3355 = vmatprep.subr.mxu0 %v2605_v19  ;;  %3390 = vmatprep.subr.mxu1 %v2621_v21 }
 0x241   :  { %3356 = vmatpush3.msra.mxu0 %v2605_v19  ;;  %3391 = vmatpush3.msra.mxu1 %v2621_v21  ;;  %v1893_v19 = vld [vmem:[%s4683_s5 + $0x198] sm:$0xff]  ;;  %v1844_v21 = vld [vmem:[%s4683_s5 + $0x10] sm:$0xff] }
 0x242   :  { %3357 = vmatprep.subr.mxu0 %v2604_v23  ;;  %3392 = vmatprep.subr.mxu1 %v2620_v24 }
 0x243   :  { %3358 = vmatpush3.msra.mxu0 %v2604_v23  ;;  %3393 = vmatpush3.msra.mxu1 %v2620_v24  ;;  %v1877_v23 = vld [vmem:[%s4683_s5 + $0x118] sm:$0xff]  ;;  %v1859_v24 = vld [vmem:[%s4683_s5 + $0x88] sm:$0xff] }
 0x244   :  { %3359 = vmatprep.subr.mxu0 %v2603_v25  ;;  %3394 = vmatprep.subr.mxu1 %v2619_v26 }
 0x245   :  { %3360 = vmatpush3.msra.mxu0 %v2603_v25  ;;  %3395 = vmatpush3.msra.mxu1 %v2619_v26  ;;  %v1892_v25 = vld [vmem:[%s4683_s5 + $0x190] sm:$0xff]  ;;  %v1843_v26 = vld [vmem:[%s4683_s5 + $0x8] sm:$0xff] }
 0x246   :  { %3361 = vmatprep.subr.mxu0 %v2602_v27  ;;  %3396 = vmatprep.subr.mxu1 %v2618_v29 }
 0x247   :  { %3362 = vmatpush3.msra.mxu0 %v2602_v27  ;;  %3397 = vmatpush3.msra.mxu1 %v2618_v29  ;;  %v1876_v27 = vld [vmem:[%s4683_s5 + $0x110] sm:$0xff]  ;;  %v1858_v29 = vld [vmem:[%s4683_s5 + $0x80] sm:$0xff] }
 0x248   :  { %3363 = vmatprep.subr.mxu0 %v2601_v32  ;;  %3398 = vmatprep.subr.mxu1 %v2617_v31 }
 0x249   :  { %3364 = vmatpush3.msra.mxu0 %v2601_v32  ;;  %3399 = vmatpush3.msra.mxu1 %v2617_v31  ;;  %v1891_v32 = vld [vmem:[%s4683_s5 + $0x188] sm:$0xff]  ;;  %v1842_v31 = vld [vmem:[%s4683_s5] sm:$0xff] }
 0x24a   :  { %3365 = vmatprep.subr.mxu0 %v2600_v33  ;;  %3400 = vmatprep.subr.mxu1 %v2616_v34 }
 0x24b   :  { %3366 = vmatpush3.msra.mxu0 %v2600_v33  ;;  %3401 = vmatpush3.msra.mxu1 %v2616_v34  ;;  %v1875_v33 = vld [vmem:[%s4683_s5 + $0x108] sm:$0xff]  ;;  %v1890_v34 = vld [vmem:[%s4683_s5 + $0x180] sm:$0xff] }
 0x24c   :  { %3368 = vmatmul.mubr.f32.vlgmr.msra.gmra.mxu0 %v1530_v30  ;;  %3403 = vmatmul.mubr.f32.vlgmr.msra.gmra.mxu1 %v3443_v35  ;;  %v1889_v30 = vld [vmem:[%s4683_s5 + $0x178] sm:$0xff] }
 0x24d   :  { %2851 = vmatprep.subr.mxu0 %v1873_v36  ;;  %2886 = vmatprep.subr.mxu1 %v1905_v39  ;;  %v1937_v35 = vld [vmem:[%s4683_s5 + $0x2f8] sm:$0xff]  ;;  %v1874_v36 = vld [vmem:[%s4683_s5 + $0x100] sm:$0xff] }
 0x24e   :  { %2852 = vmatpush3.msra.mxu0 %v1857_v37  ;;  %2887 = vmatpush3.msra.mxu1 %v1889_v30  ;;  %v1969_v37 = vld [vmem:[%s4683_s5 + $0x3f8] sm:$0xff] }
 0x24f   :  { %2853 = vmatprep.subr.mxu0 %v1872_v38  ;;  %2888 = vmatprep.subr.mxu1 %v1904_v41  ;;  %v3124_v38 = vpop.f32.mrf.mxu1 }
 0x250   :  { %2854 = vmatpush3.msra.mxu0 %v1856_v20  ;;  %2889 = vmatpush3.msra.mxu1 %v1888_v43 }
 0x251   :  { %2855 = vmatprep.subr.mxu0 %v1871_v40  ;;  %2890 = vmatprep.subr.mxu1 %v1903_v44  ;;  %v1051_v20 = vpop.f32.mrf.mxu1 }
 0x252   :  { %2856 = vmatpush3.msra.mxu0 %v1855_v42  ;;  %2891 = vmatpush3.msra.mxu1 %v1887_v46 }
 0x253   :  { %2857 = vmatprep.subr.mxu0 %v1870_v45  ;;  %2892 = vmatprep.subr.mxu1 %v1902_v48 }
 0x254   :  { %2858 = vmatpush3.msra.mxu0 %v1854_v47  ;;  %2893 = vmatpush3.msra.mxu1 %v1886_v50 }
 0x255   :  { %2859 = vmatprep.subr.mxu0 %v1869_v49  ;;  %2894 = vmatprep.subr.mxu1 %v1901_v52 }
 0x256   :  { %2860 = vmatpush3.msra.mxu0 %v1853_v51  ;;  %2895 = vmatpush3.msra.mxu1 %v1885_v54 }
 0x257   :  { %2861 = vmatprep.subr.mxu0 %v1868_v53  ;;  %2896 = vmatprep.subr.mxu1 %v1900_v56 }
 0x258   :  { %2862 = vmatpush3.msra.mxu0 %v1852_v55  ;;  %2897 = vmatpush3.msra.mxu1 %v1884_v59 }
 0x259   :  { %2863 = vmatprep.subr.mxu0 %v1867_v57  ;;  %2898 = vmatprep.subr.mxu1 %v1899_v61 }
 0x25a   :  { %2864 = vmatpush3.msra.mxu0 %v1851_v58  ;;  %2899 = vmatpush3.msra.mxu1 %v1883_v63 }
 0x25b   :  { %2865 = vmatprep.subr.mxu0 %v1866_v60  ;;  %2900 = vmatprep.subr.mxu1 %v1898_v1  ;;  %v3476_v1 = vmov 1966171168  }
 0x25c   :  { %2866 = vmatpush3.msra.mxu0 %v1850_v62  ;;  %2901 = vmatpush3.msra.mxu1 %v1882_v3  ;;  %v1984_v3 = vlaneseq }
 0x25d   :  { %2867 = vmatprep.subr.mxu0 %v1865_v0  ;;  %2902 = vmatprep.subr.mxu1 %v1897_v5 }
 0x25e   :  { %2868 = vmatpush3.msra.mxu0 %v1849_v2  ;;  %2903 = vmatpush3.msra.mxu1 %v1881_v7  ;;  %v1982_v2 = vunpack.c.l.s4 %v3476_v1  ;;  %v1927_v1 = vld [vmem:[%s4683_s5 + $0x2a8] sm:$0xff] }
 0x25f   :  { %2869 = vmatprep.subr.mxu0 %v1864_v4  ;;  %2904 = vmatprep.subr.mxu1 %v1896_v28  ;;  %v2632_v4 = vld [vmem:[%s4682_s4] ss:$0 sm:$0xff] }
 0x260   :  { %2870 = vmatpush3.msra.mxu0 %v1848_v6  ;;  %2905 = vmatpush3.msra.mxu1 %v1880_v9  ;;  %v1983_v9 = vunpack.c.0.s8 %v1982_v2  ;;  %v1960_v2 = vld [vmem:[%s4683_s5 + $0x3b0] sm:$0xff] }
 0x261   :  { %2871 = vmatprep.subr.mxu0 %v1863_v22  ;;  %2906 = vmatprep.subr.mxu1 %v1895_v11 }
 0x262   :  { %2872 = vmatpush3.msra.mxu0 %v1847_v8  ;;  %2907 = vmatpush3.msra.mxu1 %v1879_v13 }
 0x263   :  { %2873 = vmatprep.subr.mxu0 %v1862_v10  ;;  %2908 = vmatprep.subr.mxu1 %v1894_v15  ;;  %v4414_v10 = vshrl.u32 %v1984_v3, 7  ;;  %v1911_v3 = vld [vmem:[%s4683_s5 + $0x228] sm:$0xff] }
 0x264   :  { %2874 = vmatpush3.msra.mxu0 %v1846_v12  ;;  %2909 = vmatpush3.msra.mxu1 %v1878_v17 }
 0x265   :  { %2875 = vmatprep.subr.mxu0 %v1861_v14  ;;  %2910 = vmatprep.subr.mxu1 %v1893_v19  ;;  %v4417_v14 = vsub.s32 %v1983_v9, %v4414_v10  ;;  %v1909_v9 = vld [vmem:[%s4683_s5 + $0x218] sm:$0xff] }
 0x266   :  { %2876 = vmatpush3.msra.mxu0 %v1845_v16  ;;  %2911 = vmatpush3.msra.mxu1 %v1877_v23 }
 0x267   :  { %2877 = vmatprep.subr.mxu0 %v1860_v18  ;;  %2912 = vmatprep.subr.mxu1 %v1892_v25  ;;  %v1921_v25 = vld [vmem:[%s4683_s5 + $0x278] sm:$0xff] }
 0x268   :  { %2878 = vmatpush3.msra.mxu0 %v1844_v21  ;;  %2913 = vmatpush3.msra.mxu1 %v1876_v27  ;;  %v1936_v27 = vld [vmem:[%s4683_s5 + $0x2f0] sm:$0xff] }
 0x269   :  { %2879 = vmatprep.subr.mxu0 %v1859_v24  ;;  %2914 = vmatprep.subr.mxu1 %v1891_v32  ;;  %v1920_v32 = vld [vmem:[%s4683_s5 + $0x270] sm:$0xff] }
 0x26a   :  { %2880 = vmatpush3.msra.mxu0 %v1843_v26  ;;  %2915 = vmatpush3.msra.mxu1 %v1875_v33  ;;  %v1953_v33 = vld [vmem:[%s4683_s5 + $0x378] sm:$0xff] }
 0x26b   :  { %2881 = vmatprep.subr.mxu0 %v1858_v29  ;;  %2916 = vmatprep.subr.mxu1 %v1890_v34  ;;  %v1935_v34 = vld [vmem:[%s4683_s5 + $0x2e8] sm:$0xff] }
 0x26c   :  { %2882 = vmatpush3.msra.mxu0 %v1842_v31  ;;  %2917 = vmatpush3.msra.mxu1 %v1874_v36 }
 0x26d   :  { %2921 = vmatprep.subr.mxu0 %v1937_v35  ;;  %2956 = vmatprep.subr.mxu1 %v1969_v37  ;;  %v1968_v35 = vld [vmem:[%s4683_s5 + $0x3f0] sm:$0xff]  ;;  %v1919_v37 = vld [vmem:[%s4683_s5 + $0x268] sm:$0xff] }
 0x2a7   :  { %v3159_v39 = vpop.f32.mrf.mxu0  ;;  %v3194_v30 = vpop.f32.mrf.mxu1 }
 0x2a8   :  { %v1132_v41 = vadd.f32 %v3159_v39, %v3124_v38  ;;  %v1952_v38 = vld [vmem:[%s4683_s5 + $0x370] sm:$0xff]  ;;  %v1934_v39 = vld [vmem:[%s4683_s5 + $0x2e0] sm:$0xff] }
 0x2a9   :  { %v1126_v40 = vpop.f32.mrf.mxu0  ;;  %v1224_v44 = vpop.f32.mrf.mxu1 }
 0x2aa   :  { %v1127_v43 = vadd.f32 %v1126_v40, %v1051_v20  ;;  %v1234_v45 = vadd.f32 %v3194_v30, %v1132_v41  ;;  %v1967_v20 = vld [vmem:[%s4683_s5 + $0x3e8] sm:$0xff]  ;;  %v1918_v30 = vld [vmem:[%s4683_s5 + $0x260] sm:$0xff]  ;;  %v1933_v41 = vld [vmem:[%s4683_s5 + $0x2d8] sm:$0xff] }
 0x2ab   :  { %v1951_v40 = vld [vmem:[%s4683_s5 + $0x368] sm:$0xff] }
 0x2ac   :  { %v1233_v48 = vadd.f32 %v1224_v44, %v1127_v43  ;;  %v1917_v43 = vld [vmem:[%s4683_s5 + $0x258] sm:$0xff]  ;;  %v1950_v44 = vld [vmem:[%s4683_s5 + $0x360] sm:$0xff] }
 0x2c8   :  { %v3229_v42 = vpop.f32.mrf.mxu0  ;;  %v3264_v46 = vpop.f32.mrf.mxu1 }
 0x2c9   :  { %v1334_v49 = vadd.f32 %v3229_v42, %v1234_v45  ;;  %v1966_v42 = vld [vmem:[%s4683_s5 + $0x3e0] sm:$0xff]  ;;  %v1932_v45 = vld [vmem:[%s4683_s5 + $0x2d0] sm:$0xff] }
 0x2ca   :  { %v1324_v47 = vpop.f32.mrf.mxu0  ;;  %v1418_v52 = vpop.f32.mrf.mxu1 }
 0x2cb   :  { %v1333_v51 = vadd.f32 %v1324_v47, %v1233_v48  ;;  %v1428_v53 = vadd.f32 %v3264_v46, %v1334_v49  ;;  %v1965_v46 = vld [vmem:[%s4683_s5 + $0x3d8] sm:$0xff]  ;;  %v1916_v47 = vld [vmem:[%s4683_s5 + $0x250] sm:$0xff]  ;;  %v1931_v49 = vld [vmem:[%s4683_s5 + $0x2c8] sm:$0xff] }
 0x2cc   :  { %v1949_v48 = vld [vmem:[%s4683_s5 + $0x358] sm:$0xff] }
 0x2cd   :  { %v1427_v56 = vadd.f32 %v1418_v52, %v1333_v51  ;;  %v1915_v51 = vld [vmem:[%s4683_s5 + $0x248] sm:$0xff]  ;;  %v1948_v52 = vld [vmem:[%s4683_s5 + $0x350] sm:$0xff] }
 0x2ea   :  { %v3299_v50 = vpop.f32.mrf.mxu0  ;;  %v3334_v54 = vpop.f32.mrf.mxu1 }
 0x2eb   :  { %v1528_v57 = vadd.f32 %v3299_v50, %v1428_v53  ;;  %v1964_v50 = vld [vmem:[%s4683_s5 + $0x3d0] sm:$0xff]  ;;  %v1930_v53 = vld [vmem:[%s4683_s5 + $0x2c0] sm:$0xff] }
 0x2ec   :  { %v1518_v55 = vpop.f32.mrf.mxu0  ;;  %v1626_v59 = vpop.f32.mrf.mxu1 }
 0x2ed   :  { %v1527_v58 = vadd.f32 %v1518_v55, %v1427_v56  ;;  %v1636_v60 = vadd.f32 %v3334_v54, %v1528_v57  ;;  %v1963_v54 = vld [vmem:[%s4683_s5 + $0x3c8] sm:$0xff]  ;;  %v1914_v55 = vld [vmem:[%s4683_s5 + $0x240] sm:$0xff]  ;;  %v1929_v57 = vld [vmem:[%s4683_s5 + $0x2b8] sm:$0xff] }
 0x2ee   :  { %v1947_v56 = vld [vmem:[%s4683_s5 + $0x348] sm:$0xff] }
 0x2ef   :  { %v1635_v63 = vadd.f32 %v1626_v59, %v1527_v58  ;;  %v1962_v58 = vld [vmem:[%s4683_s5 + $0x3c0] sm:$0xff]  ;;  %v1913_v59 = vld [vmem:[%s4683_s5 + $0x238] sm:$0xff] }
 0x30c   :  { %v3369_v61 = vpop.f32.mrf.mxu0  ;;  %v3404_v62 = vpop.f32.mrf.mxu1 }
 0x30d   :  { %v1730_v0 = vadd.f32 %v3369_v61, %v1636_v60  ;;  %v1946_v60 = vld [vmem:[%s4683_s5 + $0x340] sm:$0xff]  ;;  %v1928_v61 = vld [vmem:[%s4683_s5 + $0x2b0] sm:$0xff] }
 0x30e   :  { %v1720_v5 = vpop.f32.mrf.mxu0  ;;  %v1820_v22 = vpop.f32.mrf.mxu1 }
 0x30f   :  { %v1830_v6 = vadd.f32 %v3404_v62, %v1730_v0  ;;  %v1729_v7 = vadd.f32 %v1720_v5, %v1635_v63  ;;  %v1961_v62 = vld [vmem:[%s4683_s5 + $0x3b8] sm:$0xff]  ;;  %v1912_v63 = vld [vmem:[%s4683_s5 + $0x230] sm:$0xff]  ;;  %v1926_v5 = vld [vmem:[%s4683_s5 + $0x2a0] sm:$0xff] }
 0x310   :  { %v1945_v0 = vld [vmem:[%s4683_s5 + $0x338] sm:$0xff] }
 0x311   :  { %v1839_v28 = vadd.f32 %v2632_v4, %v1830_v6  ;;  %v1829_v8 = vadd.f32 %v1820_v22, %v1729_v7  ;;  %v1959_v6 = vld [vmem:[%s4683_s5 + $0x3a8] sm:$0xff]  ;;  %v1910_v7 = vld [vmem:[%s4683_s5 + $0x220] sm:$0xff] }
 0x312   :  { %v1943_v22 = vld [vmem:[%s4683_s5 + $0x328] sm:$0xff] }
 0x313   :  { %v1838_v11 = vadd.f32 %v2632_v4, %v1829_v8  ;;  %v1841_v12 = vmax.f32 %v1839_v28, 0.0  ;;  %v1944_v4 = vld [vmem:[%s4683_s5 + $0x330] sm:$0xff]  ;;  %v1925_v28 = vld [vmem:[%s4683_s5 + $0x298] sm:$0xff]  ;;  %v1958_v8 = vld [vmem:[%s4683_s5 + $0x3a0] sm:$0xff] }
 0x315   :  { %v1840_v13 = vmax.f32 %v1838_v11, 0.0  ;;  %v1942_v11 = vld [vmem:[%s4683_s5 + $0x320] sm:$0xff] }
 0x317   :  { %v1979_v15 = vcombine.low %v1840_v13, %v1841_v12  ;;  %v1980_v16 = vcombine.high %v1840_v13, %v1841_v12  ;;  %v1924_v12 = vld [vmem:[%s4683_s5 + $0x290] sm:$0xff]  ;;  %v1957_v13 = vld [vmem:[%s4683_s5 + $0x398] sm:$0xff] }
 0x319   :  { %v1987_v17 = vrot.slane %v1979_v15, %v4417_v14  ;;  %v4421_v18 = vrot.slane %v1980_v16, %v4417_v14  ;;  %v1908_v15 = vld [vmem:[%s4683_s5 + $0x210] sm:$0xff]  ;;  %v1941_v16 = vld [vmem:[%s4683_s5 + $0x318] sm:$0xff] }
 0x31b   :  { %v1995_v19 = vcombine.high %v1987_v17, %v1987_v17  ;;  %v1996_v21 = vcombine.high %v4421_v18, %v4421_v18  ;;  %v2003_v24 = vrot.slane %v1987_v17, %v4417_v14  ;;  %v1923_v17 = vld [vmem:[%s4683_s5 + $0x288] sm:$0xff] }
 0x31d   :  { %v2017_v23 = vrot.slane %v1995_v19, %v4417_v14  ;;  %v2024_v29 = vrot.slane %v1996_v21, %v4417_v14  ;;  %v2025_v31 = vcombine.high %v2003_v24, %v2003_v24  ;;  %v1956_v19 = vld [vmem:[%s4683_s5 + $0x390] sm:$0xff]  ;;  %v1907_v21 = vld [vmem:[%s4683_s5 + $0x208] sm:$0xff] }
 0x31f   :  { %2101 = vmatprep.mubr.f32.mxu0 %v2017_v23  ;;  %v2027_v26 = vcombine.high %v2017_v23, %v2017_v23  ;;  %v2028_v36 = vcombine.high %v2024_v29, %v2024_v29  ;;  %v1940_v23 = vld [vmem:[%s4683_s5 + $0x310] sm:$0xff] }
 0x320   :  { %2102 = vmatmul.mubr.f32.vlgmr.msra.gmra.mxu0 %v2003_v24  ;;  %v1922_v24 = vld [vmem:[%s4683_s5 + $0x280] sm:$0xff] }
 0x321   :  { %2922 = vmatpush3.msra.mxu0 %v1921_v25  ;;  %2171 = vmatprep.mubr.f32.mxu1 %v2027_v26  ;;  %v1955_v25 = vld [vmem:[%s4683_s5 + $0x388] sm:$0xff]  ;;  %v1906_v26 = vld [vmem:[%s4683_s5 + $0x200] sm:$0xff] }
 0x322   :  { %2923 = vmatprep.subr.mxu0 %v1936_v27  ;;  %2241 = vmatprep.mubr.f32.mxu0 %v2024_v29  ;;  %v1939_v27 = vld [vmem:[%s4683_s5 + $0x308] sm:$0xff]  ;;  %v2010_v29 = vrot.slane %v4421_v18, %v4417_v14  ;;  %v2333_v14 = vld [vmem:[%s4685_s7 + $0x78] sm:$0xff]  ;;  %v2332_v18 = vld [vmem:[%s4685_s7 + $0x70] sm:$0xff] }
 0x323   :  { %2172 = vmatmul.mubr.f32.vlgmr.msra.gmra.mxu1 %v2025_v31  ;;  %2924 = vmatpush3.msra.mxu0 %v1920_v32  ;;  %v1954_v32 = vld [vmem:[%s4683_s5 + $0x380] sm:$0xff] }
 0x324   :  { %2957 = vmatpush3.msra.mxu1 %v1953_v33  ;;  %2925 = vmatprep.subr.mxu0 %v1935_v34  ;;  %v1938_v31 = vld [vmem:[%s4683_s5 + $0x300] sm:$0xff]  ;;  %v2026_v33 = vcombine.high %v2010_v29, %v2010_v29  ;;  %v2331_v34 = vld [vmem:[%s4685_s7 + $0x68] sm:$0xff] }
 0x325   :  { %2958 = vmatprep.subr.mxu1 %v1968_v35  ;;  %2311 = vmatprep.mubr.f32.mxu1 %v2028_v36  ;;  %v2330_v35 = vld [vmem:[%s4685_s7 + $0x60] sm:$0xff]  ;;  %v2329_v36 = vld [vmem:[%s4685_s7 + $0x58] sm:$0xff] }
 0x326   :  { %2926 = vmatpush3.msra.mxu0 %v1919_v37  ;;  %2959 = vmatpush3.msra.mxu1 %v1952_v38  ;;  %v2328_v37 = vld [vmem:[%s4685_s7 + $0x50] sm:$0xff]  ;;  %v2327_v38 = vld [vmem:[%s4685_s7 + $0x48] sm:$0xff] }
 0x327   :  { %2927 = vmatprep.subr.mxu0 %v1934_v39  ;;  %2960 = vmatprep.subr.mxu1 %v1967_v20  ;;  %v2326_v39 = vld [vmem:[%s4685_s7 + $0x40] sm:$0xff]  ;;  %v2325_v20 = vld [vmem:[%s4685_s7 + $0x38] sm:$0xff] }
 0x328   :  { %2928 = vmatpush3.msra.mxu0 %v1918_v30  ;;  %2961 = vmatpush3.msra.mxu1 %v1951_v40  ;;  %v2324_v30 = vld [vmem:[%s4685_s7 + $0x30] sm:$0xff]  ;;  %v2323_v40 = vld [vmem:[%s4685_s7 + $0x28] sm:$0xff] }
 0x329   :  { %2929 = vmatprep.subr.mxu0 %v1933_v41  ;;  %2962 = vmatprep.subr.mxu1 %v1966_v42  ;;  %v2322_v41 = vld [vmem:[%s4685_s7 + $0x20] sm:$0xff]  ;;  %v2321_v42 = vld [vmem:[%s4685_s7 + $0x18] sm:$0xff] }
 0x32a   :  { %2930 = vmatpush3.msra.mxu0 %v1917_v43  ;;  %2963 = vmatpush3.msra.mxu1 %v1950_v44  ;;  %v2320_v43 = vld [vmem:[%s4685_s7 + $0x10] sm:$0xff]  ;;  %v2319_v44 = vld [vmem:[%s4685_s7 + $0x8] sm:$0xff] }
 0x32b   :  { %2931 = vmatprep.subr.mxu0 %v1932_v45  ;;  %2964 = vmatprep.subr.mxu1 %v1965_v46  ;;  %v2318_v45 = vld [vmem:[%s4685_s7] sm:$0xff]  ;;  %v3477_v46 = vmov 0.0  }
 0x32c   :  { %2932 = vmatpush3.msra.mxu0 %v1916_v47  ;;  %2965 = vmatpush3.msra.mxu1 %v1949_v48 }
 0x32d   :  { %2933 = vmatprep.subr.mxu0 %v1931_v49  ;;  %2966 = vmatprep.subr.mxu1 %v1964_v50 }
 0x32e   :  { %2934 = vmatpush3.msra.mxu0 %v1915_v51  ;;  %2967 = vmatpush3.msra.mxu1 %v1948_v52  ;;  %v2633_v51 = vld [vmem:[%s4684_s6] ss:$0 sm:$0xff] }
 0x32f   :  { %2935 = vmatprep.subr.mxu0 %v1930_v53  ;;  %2968 = vmatprep.subr.mxu1 %v1963_v54 }
 0x330   :  { %2936 = vmatpush3.msra.mxu0 %v1914_v55  ;;  %2969 = vmatpush3.msra.mxu1 %v1947_v56 }
 0x331   :  { %2937 = vmatprep.subr.mxu0 %v1929_v57  ;;  %2970 = vmatprep.subr.mxu1 %v1962_v58 }
 0x332   :  { %2938 = vmatpush3.msra.mxu0 %v1913_v59  ;;  %2971 = vmatpush3.msra.mxu1 %v1946_v60 }
 0x333   :  { %2939 = vmatprep.subr.mxu0 %v1928_v61  ;;  %2972 = vmatprep.subr.mxu1 %v1961_v62 }
 0x334   :  { %2940 = vmatpush3.msra.mxu0 %v1912_v63  ;;  %2973 = vmatpush3.msra.mxu1 %v1945_v0 }
 0x335   :  { %2941 = vmatprep.subr.mxu0 %v1927_v1  ;;  %2974 = vmatprep.subr.mxu1 %v1960_v2  ;;  %v2338_v1 = vsub.s32 0, %v4414_v10  ;;  %v2334_v2 = vld [vmem:[%s4686_s8] sm:$0x3]  ;;  %s3478_s8 = smov [#allocation2]  }
 0x336   :  { %2942 = vmatpush3.msra.mxu0 %v1911_v3  ;;  %2975 = vmatpush3.msra.mxu1 %v1944_v4  ;;  %v2342_v3 = vsub.s32 1, %v4414_v10  ;;  %s2441_s23 = sshll.u32 %s3478_s8, 4  ;;  %s2442_s23 = int_to_ptr.vmem [resolvable:$true] %s2441_s23 }
 0x337   :  { %2943 = vmatprep.subr.mxu0 %v1926_v5  ;;  %2976 = vmatprep.subr.mxu1 %v1959_v6  ;;  %v2339_v4 = vrot.slane %v2334_v2, %v2338_v1  ;;  %s3448_s24 = scalar_lea.vmem %s2442_s23, 32  ;;  %p3453_p1 = scmp.lt.s32.totalorder %s2442_s23, %s2442_s23 }
 0x338   :  { %2944 = vmatpush3.msra.mxu0 %v1910_v7  ;;  %2977 = vmatpush3.msra.mxu1 %v1943_v22  ;;  %v2343_v5 = vrot.slane %v2334_v2, %v2342_v3  ;;  %p3449_p0 = scmp.ne.s32.totalorder %s2442_s23, %s3448_s24  ;;  %p3454_p2 = scmp.lt.s32.totalorder %s3448_s24, %s3448_s24 }
 0x339   :  { %2945 = vmatprep.subr.mxu0 %v1925_v28  ;;  %2978 = vmatprep.subr.mxu1 %v1958_v8 }
 0x33a   :  { %2946 = vmatpush3.msra.mxu0 %v1909_v9  ;;  %2979 = vmatpush3.msra.mxu1 %v1942_v11  ;;  %p3455_p3 = por %p3454_p2, %p3453_p1 }
 0x33b   :  { %2947 = vmatprep.subr.mxu0 %v1924_v12  ;;  %2980 = vmatprep.subr.mxu1 %v1957_v13 }
 0x33c   :  { %2948 = vmatpush3.msra.mxu0 %v1908_v15  ;;  %2981 = vmatpush3.msra.mxu1 %v1941_v16  ;;  %p3456_p4 = pnand %p3455_p3, %p3449_p0 }
 0x33d   :  { %2949 = vmatprep.subr.mxu0 %v1923_v17  ;;  %2982 = vmatprep.subr.mxu1 %v1956_v19 }
 0x33e   :  { %2950 = vmatpush3.msra.mxu0 %v1907_v21  ;;  %2983 = vmatpush3.msra.mxu1 %v1940_v23 }
 0x33f   :  { %2951 = vmatprep.subr.mxu0 %v1922_v24  ;;  %2984 = vmatprep.subr.mxu1 %v1955_v25 }
 0x340   :  { %2952 = vmatpush3.msra.mxu0 %v1906_v26  ;;  %2985 = vmatpush3.msra.mxu1 %v1939_v27 }
 0x341   :  { %2242 = vmatmul.mubr.f32.vlgmr.msra.gmra.mxu0 %v2010_v29  ;;  %2986 = vmatprep.subr.mxu1 %v1954_v32 }
 0x342   :  { %2987 = vmatpush3.msra.mxu1 %v1938_v31  ;;  %2366 = vmatprep.subr.mxu0 %v2333_v14 }
 0x343   :  { %2312 = vmatmul.mubr.f32.vlgmr.msra.gmra.mxu1 %v2026_v33  ;;  %2367 = vmatpush1.msra.mxu0 %v2332_v18 }
 0x344   :  { %2368 = vmatprep.subr.mxu0 %v2331_v34  ;;  %2414 = vmatprep.mubr.f32.mxu0 %v3477_v46 }
 0x345   :  { %2369 = vmatpush1.msra.mxu0 %v2330_v35 }
 0x346   :  { %2370 = vmatprep.subr.mxu0 %v2329_v36 }
 0x347   :  { %2371 = vmatpush1.msra.mxu0 %v2328_v37 }
 0x348   :  { %2372 = vmatprep.subr.mxu0 %v2327_v38 }
 0x349   :  { %2373 = vmatpush1.msra.mxu0 %v2326_v39 }
 0x34a   :  { %2374 = vmatprep.subr.mxu0 %v2325_v20 }
 0x34b   :  { %2375 = vmatpush1.msra.mxu0 %v2324_v30 }
 0x34c   :  { %2376 = vmatprep.subr.mxu0 %v2323_v40 }
 0x34d   :  { %2377 = vmatpush1.msra.mxu0 %v2322_v41 }
 0x34e   :  { %2378 = vmatprep.subr.mxu0 %v2321_v42 }
 0x34f   :  { %2379 = vmatpush1.msra.mxu0 %v2320_v43 }
 0x350   :  { %2380 = vmatprep.subr.mxu0 %v2319_v44 }
 0x351   :  { %2381 = vmatpush1.msra.mxu0 %v2318_v45 }
 0x3e0   :  { %v2883_v47 = vpop.f32.mrf.mxu0 }
 0x3e2   :  { %v2884_v48 = vpop.f32.mrf.mxu0 }
 0x3e3   :  { %v2918_v49 = vpop.f32.mrf.mxu1  ;;  %v2885_v50 = vadd.f32 %v2884_v48, %v2883_v47 }
 0x3e5   :  { %v2919_v52 = vpop.f32.mrf.mxu1  ;;  %v2104_v53 = vadd.f32 %v2885_v50, %v2633_v51 }
 0x3e6   :  { %v2920_v54 = vadd.f32 %v2919_v52, %v2918_v49 }
 0x3e8   :  { %v2174_v58 = vadd.f32 %v2920_v54, %v2104_v53 }
 0x401   :  { %v2953_v55 = vpop.f32.mrf.mxu0 }
 0x403   :  { %v2954_v56 = vpop.f32.mrf.mxu0  ;;  %v2988_v57 = vpop.f32.mrf.mxu1 }
 0x404   :  { %v2955_v59 = vadd.f32 %v2954_v56, %v2953_v55 }
 0x405   :  { %v2989_v60 = vpop.f32.mrf.mxu1 }
 0x406   :  { %v2244_v61 = vadd.f32 %v2955_v59, %v2174_v58  ;;  %v2990_v62 = vadd.f32 %v2989_v60, %v2988_v57 }
 0x408   :  { %v2314_v63 = vadd.f32 %v2990_v62, %v2244_v61 }
 0x40a   :  { %v2317_v0 = vmax.f32 %v2314_v63, 0.0 }
 0x40c   :  { %2634 = vmatmul.mubr.msk.f32.vlgmr.msra.gmra.mxu0 %vm2346_vm3, %v2317_v0 }
 0x4cc   :  { %v2416_v6 = vpop.f32.mrf.mxu0 }
 0x4cd   :  { %v2417_v7 = vadd.f32 %v2416_v6, %v2339_v4 }
 0x4ce   :  { %v2418_v22 = vpop.f32.mrf.mxu0 }
 0x4cf   :  { %v2419_v28 = vadd.f32 %v2418_v22, %v2343_v5  ;;  %v2422_v8 = vsel %vm2421_vm4, %v2417_v7, -inf }
 0x4d0   :  { %2423 = vmax.xlane.f32.xlu0 %v2422_v8 }
 0x4d1   :  { %2434 = vst [vmem:[%s4688_s10] sm:$0x3] %v2419_v28 }
 0x559   :  { %v2424_v9 = vpop.xlane.xlu0 %2423 }
 0x55a   :  { %v2425_v11 = vsub.f32 %v2417_v7, %v2424_v9 }
 0x55c   :  { %v2426_v12 = vmul.f32 1.442695, %v2425_v11 }
 0x55e   :  { %3444 = vpow2.f32 %v2426_v12 }
 0x56b   :  { %v3445_v13 = vpop.eup %3444 }
 0x56c   :  { %v2428_v15 = vsel %vm2421_vm4, %v3445_v13, 0.0 }
 0x56d   :  { %2429 = vadd.xlane.f32.xlu1 %v2428_v15 }
 0x5f6   :  { %v2430_v10 = vpop.xlane.xlu1 %2429 }
 0x5f7   :  { %3446 = vrcp.f32 %v2430_v10 }
 0x604   :  { %v3447_v16 = vpop.eup %3446 }
 0x605   :  { %v2432_v17 = vmul.f32 %v3447_v16, %v3445_v13 }
 0x607   :  { %2433 = vst [vmem:[#allocation2] sm:$0x3] %v2432_v17 }
 0x608   :  { %3459 = shalt.err (!%p3456_p4)
}
 0x609   :  { %2444 = dma.vmem_to_hbm [thread:$0]  %s2442_s23, 32, %s4687_s9, [#allocation3]  }
 0x60a   :  { %3468 = dma.done.wait [#allocation3], 32  }
 0x60b   :  { %3469 = vsyncadd [#allocation3], 4294967264 }
 0x60c   :  { %2452 = vsyncpa [#allocation3], 1 }

</bundles_post_ra>
